<compile_context>
chip_gen: v6e
topology: v6e:2x2x1
jax: 0.10.0
libtpu: 0.0.40
codegen_flags: <defaults>
</compile_context>

<pallas_src>
import functools

import jax
import jax.numpy as jnp
from jax.experimental import pallas as pl
from jax.experimental.pallas import tpu as pltpu


def _cpe_kernel(x_ref, w_ref, b_ref, o_ref, xpad_ref, *, K):
    """One (batch, channel-tile) block per grid step, NHWC layout.

    x_ref:    (1, H, W, Cb)        input block (channels on lanes)
    w_ref:    (K*K, Cb)            f32 depthwise taps; centre tap has +1 folded
    b_ref:    (1, Cb)              f32 bias
    o_ref:    (1, H, W, Cb)        output block
    xpad_ref: (H+2p, W+2p, Cb)     f32 scratch; data centred, halo ring zeroed
    """
    pad = K // 2
    _, H, W, Cb = x_ref.shape
    Hp = H + 2 * pad
    Wp = W + 2 * pad

    # Zero only the halo ring (top/bottom rows incl. corners, left/right cols),
    # not the whole scratch.
    if pad > 0:
        xpad_ref[pl.ds(0, pad), :, :] = jnp.zeros((pad, Wp, Cb), jnp.float32)
        xpad_ref[pl.ds(pad + H, pad), :, :] = jnp.zeros((pad, Wp, Cb), jnp.float32)
        xpad_ref[pl.ds(pad, H), pl.ds(0, pad), :] = jnp.zeros((H, pad, Cb), jnp.float32)
        xpad_ref[pl.ds(pad, H), pl.ds(pad + W, pad), :] = jnp.zeros((H, pad, Cb), jnp.float32)

    # Stage the block into the padded scratch: a single f32 cast per block.
    xpad_ref[pl.ds(pad, H), pl.ds(pad, W), :] = x_ref[0].astype(jnp.float32)

    # Bias-initialised accumulator; the +x residual lives in the centre tap.
    acc = jnp.zeros((H, W, Cb), jnp.float32) + b_ref[0]

    for dy in range(K):
        for dx in range(K):
            # Row offsets land on the (untiled) leading axis; column offsets are
            # small static sublane offsets.  The per-channel tap is a lane
            # vector that broadcasts over the spatial dims.
            win = xpad_ref[pl.ds(dy, H), pl.ds(dx, W), :]
            acc = acc + win * w_ref[dy * K + dx]

    o_ref[0] = acc.astype(o_ref.dtype)


def _pick_channel_tile(N, C, H, W):
    """Channel tile Cb: a divisor of C that is lane-aligned (multiple of 128 or
    the full C), sized so the f32 working block sits near the ~1 MiB
    DMA-pipelining sweet spot, while keeping >=2 grid steps for v7x's 2 TCs."""
    per_c = H * W * 4                       # f32 bytes per channel
    target = 1 << 20                        # ~1 MiB block target
    cands = sorted({d for d in range(128, C + 1, 128) if C % d == 0} | {C})
    fitting = [cb for cb in cands if cb * per_c <= target]
    cb = fitting[-1] if fitting else cands[0]
    if N * (C // cb) < 2:                   # keep both v7x TensorCores busy
        smaller = [d for d in cands if d < cb and N * (C // d) >= 2]
        if smaller:
            cb = smaller[-1]
    return cb


def conditional_position_encoding(x_nchw, weight_c1kk, bias_c):
    """CPE forward: depthwise conv (same padding) + bias + residual; NCHW in/out.

    x_nchw:      (N, C, H, W)
    weight_c1kk: (C, 1, K, K)   nn.Conv2d(..., groups=C) weight layout
    bias_c:      (C,)
    """
    N, C, H, W = x_nchw.shape
    K = weight_c1kk.shape[-1]
    assert K % 2 == 1, "same-padding residual add requires odd kernel size"
    pad = K // 2
    KK = K * K

    # Fold the residual into the centre tap in f32 (folding in bf16 loses the
    # tap mantissa), and lay the params out lane-major: (KK, C) taps, (1, C) bias.
    w32 = weight_c1kk.astype(jnp.float32).reshape(C, KK)
    w32 = w32.at[:, KK // 2].add(1.0)
    w_kkc = jnp.transpose(w32, (1, 0))                  # (KK, C)
    b_1c = bias_c.astype(jnp.float32).reshape(1, C)     # (1, C)

    # One transpose each way so channels sit on vreg lanes inside the kernel.
    x_nhwc = jnp.transpose(x_nchw, (0, 2, 3, 1))        # (N, H, W, C)

    Cb = _pick_channel_tile(N, C, H, W)
    grid = (N, C // Cb)

    # Scoped-VMEM budget: double-buffered in/out blocks + padded scratch +
    # headroom for whole-block temporaries; clamped so it also fits v7x (64 MiB).
    itemsize = jnp.dtype(x_nhwc.dtype).itemsize
    blk = H * W * Cb * itemsize
    scratch = (H + 2 * pad) * (W + 2 * pad) * Cb * 4
    need = 4 * blk + scratch + 6 * H * W * Cb * 4 + (4 << 20)
    vmem_limit = int(min(48 << 20, max(32 << 20, need)))

    kernel = functools.partial(_cpe_kernel, K=K)

    out_nhwc = pl.pallas_call(
        kernel,
        out_shape=jax.ShapeDtypeStruct((N, H, W, C), x_nchw.dtype),
        grid_spec=pltpu.PrefetchScalarGridSpec(
            num_scalar_prefetch=0,
            grid=grid,
            in_specs=[
                pl.BlockSpec((1, H, W, Cb), lambda n, c: (n, 0, 0, c)),
                # Params are tiny; the BlockSpec delivers the channel slice so
                # the kernel never does dynamic slicing on them.
                pl.BlockSpec((KK, Cb), lambda n, c: (0, c)),
                pl.BlockSpec((1, Cb), lambda n, c: (0, c)),
            ],
            out_specs=pl.BlockSpec((1, H, W, Cb), lambda n, c: (n, 0, 0, c)),
            scratch_shapes=[
                pltpu.VMEM((H + 2 * pad, W + 2 * pad, Cb), jnp.float32),
            ],
        ),
        compiler_params=pltpu.CompilerParams(
            # Both grid axes are independent -> megacore / v7x can split either.
            dimension_semantics=("parallel", "parallel"),
            vmem_limit_bytes=vmem_limit,
        ),
    )(x_nhwc, w_kkc, b_1c)

    return jnp.transpose(out_nhwc, (0, 3, 1, 2))


def _reference(x_nchw, weight_c1kk, bias_c):
    """Pure-JAX reference: depthwise conv2d (same padding) + bias + residual."""
    C = x_nchw.shape[1]
    K = weight_c1kk.shape[-1]
    w_hwio = jnp.transpose(weight_c1kk[:, 0], (1, 2, 0)).reshape(K, K, 1, C)
    y = jax.lax.conv_general_dilated(
        x_nchw.astype(jnp.float32),
        w_hwio.astype(jnp.float32),
        window_strides=(1, 1),
        padding="SAME",
        dimension_numbers=("NCHW", "HWIO", "NCHW"),
        feature_group_count=C,
        precision=jax.lax.Precision.HIGHEST,
    )
    y = y + bias_c.astype(jnp.float32)[None, :, None, None]
    return (y + x_nchw.astype(jnp.float32)).astype(x_nchw.dtype)


if __name__ == "__main__":
    # Small shapes consistent with the module: batch=2, channels=4, 16x16, K=3.
    N, C, H, W, K = 2, 4, 16, 16, 3

    key = jax.random.PRNGKey(0)
    kx, kw, kb = jax.random.split(key, 3)

    x = jax.random.normal(kx, (N, C, H, W), dtype=jnp.float32)
    weight = jax.random.normal(kw, (C, 1, K, K), dtype=jnp.float32) * 0.1
    bias = jax.random.normal(kb, (C,), dtype=jnp.float32) * 0.1

    out = conditional_position_encoding(x, weight, bias)
    out = jax.block_until_ready(out)

    ref = _reference(x, weight, bias)
    assert out.shape == (N, C, H, W)
    assert jnp.allclose(out, ref, atol=1e-4, rtol=1e-4), "mismatch vs reference"

    print("KERNEL_OK")
</pallas_src>

<mosaic_0001>
module attributes {stable_mosaic.version = 11 : i64} {
  func.func @_cpe_kernel(%arg0: i32, %arg1: i32, %arg2: memref<1x16x16x4xf32, #tpu.memory_space<vmem>>, %arg3: memref<9x4xf32, #tpu.memory_space<vmem>>, %arg4: memref<1x4xf32, #tpu.memory_space<vmem>>, %arg5: memref<1x16x16x4xf32, #tpu.memory_space<vmem>>, %arg6: memref<18x18x4xf32, #tpu.memory_space<vmem>>) attributes {dimension_semantics = [#tpu.dimension_semantics<parallel>, #tpu.dimension_semantics<parallel>], iteration_bounds = array<i64: 2, 1>, scalar_prefetch = 0 : i64, scratch_operands = 1 : i64, tpu.core_type = #tpu.core_type<tc>, window_params = [{transform_indices = @transform_0, window_bounds = array<i64: 1, 16, 16, 4>}, {transform_indices = @transform_1, window_bounds = array<i64: 9, 4>}, {transform_indices = @transform_2, window_bounds = array<i64: 1, 4>}, {transform_indices = @transform_3, window_bounds = array<i64: 1, 16, 16, 4>}]} {
    %cst = arith.constant 0.000000e+00 : f32
    %0 = vector.broadcast %cst : f32 to vector<1x18x4xf32>
    %c0 = arith.constant 0 : index
    %c0_0 = arith.constant 0 : index
    %c0_1 = arith.constant 0 : index
    %1 = vector.load %arg6[%c0, %c0_0, %c0_1] : memref<18x18x4xf32, #tpu.memory_space<vmem>>, vector<1x18x4xf32>
    tpu.vector_store %arg6[%c0, %c0_0, %c0_1], %0 {strides = array<i32>} : memref<18x18x4xf32, #tpu.memory_space<vmem>>, vector<1x18x4xf32>,
    %cst_2 = arith.constant 0.000000e+00 : f32
    %2 = vector.broadcast %cst_2 : f32 to vector<1x18x4xf32>
    %c17 = arith.constant 17 : index
    %c0_3 = arith.constant 0 : index
    %c0_4 = arith.constant 0 : index
    %3 = vector.load %arg6[%c17, %c0_3, %c0_4] : memref<18x18x4xf32, #tpu.memory_space<vmem>>, vector<1x18x4xf32>
    tpu.vector_store %arg6[%c17, %c0_3, %c0_4], %2 {strides = array<i32>} : memref<18x18x4xf32, #tpu.memory_space<vmem>>, vector<1x18x4xf32>,
    %cst_5 = arith.constant 0.000000e+00 : f32
    %4 = vector.broadcast %cst_5 : f32 to vector<16x1x4xf32>
    %c1 = arith.constant 1 : index
    %c0_6 = arith.constant 0 : index
    %c0_7 = arith.constant 0 : index
    %5 = vector.load %arg6[%c1, %c0_6, %c0_7] : memref<18x18x4xf32, #tpu.memory_space<vmem>>, vector<16x1x4xf32>
    tpu.vector_store %arg6[%c1, %c0_6, %c0_7], %4 {strides = array<i32>} : memref<18x18x4xf32, #tpu.memory_space<vmem>>, vector<16x1x4xf32>,
    %cst_8 = arith.constant 0.000000e+00 : f32
    %6 = vector.broadcast %cst_8 : f32 to vector<16x1x4xf32>
    %c1_9 = arith.constant 1 : index
    %c17_10 = arith.constant 17 : index
    %c0_11 = arith.constant 0 : index
    %7 = vector.load %arg6[%c1_9, %c17_10, %c0_11] : memref<18x18x4xf32, #tpu.memory_space<vmem>>, vector<16x1x4xf32>
    tpu.vector_store %arg6[%c1_9, %c17_10, %c0_11], %6 {strides = array<i32>} : memref<18x18x4xf32, #tpu.memory_space<vmem>>, vector<16x1x4xf32>,
    %c0_12 = arith.constant 0 : index
    %c0_13 = arith.constant 0 : index
    %c0_14 = arith.constant 0 : index
    %c0_15 = arith.constant 0 : index
    %8 = vector.load %arg2[%c0_12, %c0_13, %c0_14, %c0_15] : memref<1x16x16x4xf32, #tpu.memory_space<vmem>>, vector<1x16x16x4xf32>
    %9 = vector.shape_cast %8 : vector<1x16x16x4xf32> to vector<16x16x4xf32>
    %c1_16 = arith.constant 1 : index
    %c1_17 = arith.constant 1 : index
    %c0_18 = arith.constant 0 : index
    %10 = vector.load %arg6[%c1_16, %c1_17, %c0_18] : memref<18x18x4xf32, #tpu.memory_space<vmem>>, vector<16x16x4xf32>
    tpu.vector_store %arg6[%c1_16, %c1_17, %c0_18], %9 {strides = array<i32>} : memref<18x18x4xf32, #tpu.memory_space<vmem>>, vector<16x16x4xf32>,
    %cst_19 = arith.constant 0.000000e+00 : f32
    %11 = vector.broadcast %cst_19 : f32 to vector<16x16x4xf32>
    %c0_20 = arith.constant 0 : index
    %c0_21 = arith.constant 0 : index
    %12 = vector.load %arg4[%c0_20, %c0_21] : memref<1x4xf32, #tpu.memory_space<vmem>>, vector<1x4xf32>
    %13 = vector.shape_cast %12 : vector<1x4xf32> to vector<4xf32>
    %14 = vector.shape_cast %13 : vector<4xf32> to vector<1x1x4xf32>
    %15 = vector.broadcast %14 : vector<1x1x4xf32> to vector<16x16x4xf32>
    %16 = arith.addf %11, %15 : vector<16x16x4xf32>
    %c0_22 = arith.constant 0 : index
    %c0_23 = arith.constant 0 : index
    %c0_24 = arith.constant 0 : index
    %17 = vector.load %arg6[%c0_22, %c0_23, %c0_24] : memref<18x18x4xf32, #tpu.memory_space<vmem>>, vector<16x16x4xf32>
    %c0_25 = arith.constant 0 : index
    %c0_26 = arith.constant 0 : index
    %18 = vector.load %arg3[%c0_25, %c0_26] : memref<9x4xf32, #tpu.memory_space<vmem>>, vector<1x4xf32>
    %19 = vector.shape_cast %18 : vector<1x4xf32> to vector<4xf32>
    %20 = vector.shape_cast %19 : vector<4xf32> to vector<1x1x4xf32>
    %21 = vector.broadcast %20 : vector<1x1x4xf32> to vector<16x16x4xf32>
    %22 = arith.mulf %17, %21 : vector<16x16x4xf32>
    %23 = arith.addf %16, %22 : vector<16x16x4xf32>
    %c0_27 = arith.constant 0 : index
    %c1_28 = arith.constant 1 : index
    %c0_29 = arith.constant 0 : index
    %24 = vector.load %arg6[%c0_27, %c1_28, %c0_29] : memref<18x18x4xf32, #tpu.memory_space<vmem>>, vector<16x16x4xf32>
    %c1_30 = arith.constant 1 : index
    %c0_31 = arith.constant 0 : index
    %25 = vector.load %arg3[%c1_30, %c0_31] : memref<9x4xf32, #tpu.memory_space<vmem>>, vector<1x4xf32>
    %26 = vector.shape_cast %25 : vector<1x4xf32> to vector<4xf32>
    %27 = vector.shape_cast %26 : vector<4xf32> to vector<1x1x4xf32>
    %28 = vector.broadcast %27 : vector<1x1x4xf32> to vector<16x16x4xf32>
    %29 = arith.mulf %24, %28 : vector<16x16x4xf32>
    %30 = arith.addf %23, %29 : vector<16x16x4xf32>
    %c0_32 = arith.constant 0 : index
    %c2 = arith.constant 2 : index
    %c0_33 = arith.constant 0 : index
    %31 = vector.load %arg6[%c0_32, %c2, %c0_33] : memref<18x18x4xf32, #tpu.memory_space<vmem>>, vector<16x16x4xf32>
    %c2_34 = arith.constant 2 : index
    %c0_35 = arith.constant 0 : index
    %32 = vector.load %arg3[%c2_34, %c0_35] : memref<9x4xf32, #tpu.memory_space<vmem>>, vector<1x4xf32>
    %33 = vector.shape_cast %32 : vector<1x4xf32> to vector<4xf32>
    %34 = vector.shape_cast %33 : vector<4xf32> to vector<1x1x4xf32>
    %35 = vector.broadcast %34 : vector<1x1x4xf32> to vector<16x16x4xf32>
    %36 = arith.mulf %31, %35 : vector<16x16x4xf32>
    %37 = arith.addf %30, %36 : vector<16x16x4xf32>
    %c1_36 = arith.constant 1 : index
    %c0_37 = arith.constant 0 : index
    %c0_38 = arith.constant 0 : index
    %38 = vector.load %arg6[%c1_36, %c0_37, %c0_38] : memref<18x18x4xf32, #tpu.memory_space<vmem>>, vector<16x16x4xf32>
    %c3 = arith.constant 3 : index
    %c0_39 = arith.constant 0 : index
    %39 = vector.load %arg3[%c3, %c0_39] : memref<9x4xf32, #tpu.memory_space<vmem>>, vector<1x4xf32>
    %40 = vector.shape_cast %39 : vector<1x4xf32> to vector<4xf32>
    %41 = vector.shape_cast %40 : vector<4xf32> to vector<1x1x4xf32>
    %42 = vector.broadcast %41 : vector<1x1x4xf32> to vector<16x16x4xf32>
    %43 = arith.mulf %38, %42 : vector<16x16x4xf32>
    %44 = arith.addf %37, %43 : vector<16x16x4xf32>
    %c1_40 = arith.constant 1 : index
    %c1_41 = arith.constant 1 : index
    %c0_42 = arith.constant 0 : index
    %45 = vector.load %arg6[%c1_40, %c1_41, %c0_42] : memref<18x18x4xf32, #tpu.memory_space<vmem>>, vector<16x16x4xf32>
    %c4 = arith.constant 4 : index
    %c0_43 = arith.constant 0 : index
    %46 = vector.load %arg3[%c4, %c0_43] : memref<9x4xf32, #tpu.memory_space<vmem>>, vector<1x4xf32>
    %47 = vector.shape_cast %46 : vector<1x4xf32> to vector<4xf32>
    %48 = vector.shape_cast %47 : vector<4xf32> to vector<1x1x4xf32>
    %49 = vector.broadcast %48 : vector<1x1x4xf32> to vector<16x16x4xf32>
    %50 = arith.mulf %45, %49 : vector<16x16x4xf32>
    %51 = arith.addf %44, %50 : vector<16x16x4xf32>
    %c1_44 = arith.constant 1 : index
    %c2_45 = arith.constant 2 : index
    %c0_46 = arith.constant 0 : index
    %52 = vector.load %arg6[%c1_44, %c2_45, %c0_46] : memref<18x18x4xf32, #tpu.memory_space<vmem>>, vector<16x16x4xf32>
    %c5 = arith.constant 5 : index
    %c0_47 = arith.constant 0 : index
    %53 = vector.load %arg3[%c5, %c0_47] : memref<9x4xf32, #tpu.memory_space<vmem>>, vector<1x4xf32>
    %54 = vector.shape_cast %53 : vector<1x4xf32> to vector<4xf32>
    %55 = vector.shape_cast %54 : vector<4xf32> to vector<1x1x4xf32>
    %56 = vector.broadcast %55 : vector<1x1x4xf32> to vector<16x16x4xf32>
    %57 = arith.mulf %52, %56 : vector<16x16x4xf32>
    %58 = arith.addf %51, %57 : vector<16x16x4xf32>
    %c2_48 = arith.constant 2 : index
    %c0_49 = arith.constant 0 : index
    %c0_50 = arith.constant 0 : index
    %59 = vector.load %arg6[%c2_48, %c0_49, %c0_50] : memref<18x18x4xf32, #tpu.memory_space<vmem>>, vector<16x16x4xf32>
    %c6 = arith.constant 6 : index
    %c0_51 = arith.constant 0 : index
    %60 = vector.load %arg3[%c6, %c0_51] : memref<9x4xf32, #tpu.memory_space<vmem>>, vector<1x4xf32>
    %61 = vector.shape_cast %60 : vector<1x4xf32> to vector<4xf32>
    %62 = vector.shape_cast %61 : vector<4xf32> to vector<1x1x4xf32>
    %63 = vector.broadcast %62 : vector<1x1x4xf32> to vector<16x16x4xf32>
    %64 = arith.mulf %59, %63 : vector<16x16x4xf32>
    %65 = arith.addf %58, %64 : vector<16x16x4xf32>
    %c2_52 = arith.constant 2 : index
    %c1_53 = arith.constant 1 : index
    %c0_54 = arith.constant 0 : index
    %66 = vector.load %arg6[%c2_52, %c1_53, %c0_54] : memref<18x18x4xf32, #tpu.memory_space<vmem>>, vector<16x16x4xf32>
    %c7 = arith.constant 7 : index
    %c0_55 = arith.constant 0 : index
    %67 = vector.load %arg3[%c7, %c0_55] : memref<9x4xf32, #tpu.memory_space<vmem>>, vector<1x4xf32>
    %68 = vector.shape_cast %67 : vector<1x4xf32> to vector<4xf32>
    %69 = vector.shape_cast %68 : vector<4xf32> to vector<1x1x4xf32>
    %70 = vector.broadcast %69 : vector<1x1x4xf32> to vector<16x16x4xf32>
    %71 = arith.mulf %66, %70 : vector<16x16x4xf32>
    %72 = arith.addf %65, %71 : vector<16x16x4xf32>
    %c2_56 = arith.constant 2 : index
    %c2_57 = arith.constant 2 : index
    %c0_58 = arith.constant 0 : index
    %73 = vector.load %arg6[%c2_56, %c2_57, %c0_58] : memref<18x18x4xf32, #tpu.memory_space<vmem>>, vector<16x16x4xf32>
    %c8 = arith.constant 8 : index
    %c0_59 = arith.constant 0 : index
    %74 = vector.load %arg3[%c8, %c0_59] : memref<9x4xf32, #tpu.memory_space<vmem>>, vector<1x4xf32>
    %75 = vector.shape_cast %74 : vector<1x4xf32> to vector<4xf32>
    %76 = vector.shape_cast %75 : vector<4xf32> to vector<1x1x4xf32>
    %77 = vector.broadcast %76 : vector<1x1x4xf32> to vector<16x16x4xf32>
    %78 = arith.mulf %73, %77 : vector<16x16x4xf32>
    %79 = arith.addf %72, %78 : vector<16x16x4xf32>
    %c0_60 = arith.constant 0 : index
    %c0_61 = arith.constant 0 : index
    %c0_62 = arith.constant 0 : index
    %c0_63 = arith.constant 0 : index
    %80 = vector.load %arg5[%c0_60, %c0_61, %c0_62, %c0_63] : memref<1x16x16x4xf32, #tpu.memory_space<vmem>>, vector<1x16x16x4xf32>
    %81 = vector.shape_cast %80 : vector<1x16x16x4xf32> to vector<16x16x4xf32>
    %82 = vector.shape_cast %79 : vector<16x16x4xf32> to vector<1x16x16x4xf32>
    tpu.vector_store %arg5[%c0_60, %c0_61, %c0_62, %c0_63], %82 {strides = array<i32>} : memref<1x16x16x4xf32, #tpu.memory_space<vmem>>, vector<1x16x16x4xf32>,
    return
  }
  func.func @transform_0(%arg0: i32, %arg1: i32) -> (i32, i32, i32, i32) {
    %c0_i32 = arith.constant 0 : i32
    %c0_i32_0 = arith.constant 0 : i32
    %c0_i32_1 = arith.constant 0 : i32
    return %arg0, %c0_i32, %c0_i32_0, %arg1 : i32, i32, i32, i32
  }
  func.func @transform_1(%arg0: i32, %arg1: i32) -> (i32, i32) {
    %c0_i32 = arith.constant 0 : i32
    %c0_i32_0 = arith.constant 0 : i32
    return %c0_i32, %arg1 : i32, i32
  }
  func.func @transform_2(%arg0: i32, %arg1: i32) -> (i32, i32) {
    %c0_i32 = arith.constant 0 : i32
    %c0_i32_0 = arith.constant 0 : i32
    return %c0_i32, %arg1 : i32, i32
  }
  func.func @transform_3(%arg0: i32, %arg1: i32) -> (i32, i32, i32, i32) {
    %c0_i32 = arith.constant 0 : i32
    %c0_i32_0 = arith.constant 0 : i32
    %c0_i32_1 = arith.constant 0 : i32
    return %arg0, %c0_i32, %c0_i32_0, %arg1 : i32, i32, i32, i32
  }
}

</mosaic_0001>

<bundles_post_ra>
// kernel: tpu_custom_call.1
= control target key start
LH: loop header
LB: loop body
LE: loop exit
PB: predicated region body
PF: predicated region fallthrough
CT: control target
= control target key end

     0   :  { %s1506_s12 = smov 0   ;;  %s1508_s13 = smov 0   ;;  %s2280_s0 = inlined_call_operand.vmem [shape: f32[2,16,16,4], index: 0, kind: input, shape index: {}]   ;;  %s2281_s1 = inlined_call_operand.vmem [shape: f32[9,4], index: 1, kind: input, shape index: {}]   ;;  %s2282_s2 = inlined_call_operand.vmem [shape: f32[1,4], index: 2, kind: input, shape index: {}]   ;;  %s2283_s3 = inlined_call_operand.vmem [shape: f32[2,16,16,4], index: 3, kind: output, shape index: {}]  }
   0x1   :  { %s1510_s14 = smov 0  }
   0x2 LB: > { %s25_s15 = sadd.s32 1, %s1479_s13  ;;  %p1407_p0 = scmp.ge.s32.totalorder %s1483_s14, 1  ;;  %s1483_s14 = sphi %s1510_s14, %s13_s14   ;;  %s1479_s13 = sphi %s1508_s13, %s2285_s13   ;;  %s1475_s12 = sphi %s1506_s12, %s2284_s12  }
   0x3   : > { %p27_p1 = scmp.ge.s32.totalorder %s25_s15, 2  ;;  %p173_p2 = scmp.lt.s32.totalorder %s1483_s14, 3 }
   0x5   : > { %s2287_s15 = smov (%p27_p1, %s25_s15), 0  ;;  %p174_p3 = pnand %p1407_p0, %p173_p2 }
   0x6   : > { %p210_p4 = scmp.lt.s32.totalorder (!%p174_p3), %s1475_s12, 1 }
   0x7   : > { %177 = sbr.rel (%p174_p3) target bundleno = 193 (0xc1), region = 32 }
   0xc   : > { %vm233_vm0 = vcmask 31744   ;;  %vm236_vm1 = vcmask 25600   ;;  %vm243_vm2 = vcmask 24576   ;;  %v1485_v0 = vmov 0.0   ;;  %s2289_s12 = smov (!%p210_p4, %s1475_s12), 1 }
   0xd   : > { %234 = vst.msk [vmem:[#allocation2] sm:$0xff] %vm233_vm0, %v1485_v0  ;;  %235 = vst.msk [vmem:[#allocation2 + $0x8] sm:$0xff] %vm233_vm0, %v1485_v0  ;;  %s1424_s16 = sshll.u32 %s2289_s12, 8  ;;  %v1618_v22 = vld [vmem:[%s2281_s1] ss:$0 sm:$0xff] }
   0xe   : > { %239 = vst.msk [vmem:[#allocation2 + $0x198] sm:$0xff] %vm233_vm0, %v1485_v0  ;;  %240 = vst.msk [vmem:[#allocation2 + $0x1a0] sm:$0xff] %vm233_vm0, %v1485_v0  ;;  %s1574_s19 = scalar_lea.vmem %s2280_s0, %s1424_s16  ;;  %v1629_v26 = vld [vmem:[%s2281_s1 + $0x1] ss:$0 sm:$0xff]  ;;  %v1640_v30 = vld [vmem:[%s2282_s2] ss:$0 sm:$0xff]  ;;  %s1750_s20 = scalar_lea.vmem %s2283_s3, %s1424_s16 }
   0xf   : > { %237 = vst.msk [vmem:[#allocation2 + $0x10] sm:$0x3] %vm236_vm1, %v1485_v0  ;;  %241 = vst.msk [vmem:[#allocation2 + $0x1a8] sm:$0x3] %vm236_vm1, %v1485_v0  ;;  %v276_v1 = vld [vmem:[%s1574_s19] sm:$0xff]  ;;  %v277_v2 = vld [vmem:[%s1574_s19 + $0x8] sm:$0xff] }
  0x10   : > { %244 = vst.msk [vmem:[#allocation2 + $0x18] sm:$0x1] %vm243_vm2, %v1485_v0  ;;  %245 = vst.msk [vmem:[#allocation2 + $0x30] sm:$0x1] %vm243_vm2, %v1485_v0  ;;  %v278_v3 = vld [vmem:[%s1574_s19 + $0x10] sm:$0xff]  ;;  %v279_v4 = vld [vmem:[%s1574_s19 + $0x18] sm:$0xff] }
  0x11   : > { %246 = vst.msk [vmem:[#allocation2 + $0x48] sm:$0x1] %vm243_vm2, %v1485_v0  ;;  %247 = vst.msk [vmem:[#allocation2 + $0x60] sm:$0x1] %vm243_vm2, %v1485_v0  ;;  %v280_v5 = vld [vmem:[%s1574_s19 + $0x20] sm:$0xff]  ;;  %v281_v6 = vld [vmem:[%s1574_s19 + $0x28] sm:$0xff] }
  0x12   : > { %248 = vst.msk [vmem:[#allocation2 + $0x78] sm:$0x1] %vm243_vm2, %v1485_v0  ;;  %249 = vst.msk [vmem:[#allocation2 + $0x90] sm:$0x1] %vm243_vm2, %v1485_v0  ;;  %v282_v7 = vld [vmem:[%s1574_s19 + $0x30] sm:$0xff]  ;;  %v283_v8 = vld [vmem:[%s1574_s19 + $0x38] sm:$0xff] }
  0x13   : > { %250 = vst.msk [vmem:[#allocation2 + $0xa8] sm:$0x1] %vm243_vm2, %v1485_v0  ;;  %251 = vst.msk [vmem:[#allocation2 + $0xc0] sm:$0x1] %vm243_vm2, %v1485_v0  ;;  %v284_v9 = vld [vmem:[%s1574_s19 + $0x40] sm:$0xff]  ;;  %v285_v10 = vld [vmem:[%s1574_s19 + $0x48] sm:$0xff] }
  0x14   : > { %252 = vst.msk [vmem:[#allocation2 + $0xd8] sm:$0x1] %vm243_vm2, %v1485_v0  ;;  %253 = vst.msk [vmem:[#allocation2 + $0xf0] sm:$0x1] %vm243_vm2, %v1485_v0  ;;  %v286_v11 = vld [vmem:[%s1574_s19 + $0x50] sm:$0xff]  ;;  %v287_v12 = vld [vmem:[%s1574_s19 + $0x58] sm:$0xff] }
  0x15   : > { %254 = vst.msk [vmem:[#allocation2 + $0x108] sm:$0x1] %vm243_vm2, %v1485_v0  ;;  %255 = vst.msk [vmem:[#allocation2 + $0x120] sm:$0x1] %vm243_vm2, %v1485_v0  ;;  %v288_v13 = vld [vmem:[%s1574_s19 + $0x60] sm:$0xff]  ;;  %v289_v14 = vld [vmem:[%s1574_s19 + $0x68] sm:$0xff] }
  0x16   : > { %256 = vst.msk [vmem:[#allocation2 + $0x138] sm:$0x1] %vm243_vm2, %v1485_v0  ;;  %257 = vst.msk [vmem:[#allocation2 + $0x150] sm:$0x1] %vm243_vm2, %v1485_v0  ;;  %v290_v15 = vld [vmem:[%s1574_s19 + $0x70] sm:$0xff]  ;;  %v291_v16 = vld [vmem:[%s1574_s19 + $0x78] sm:$0xff] }
  0x17   : > { %258 = vst.msk [vmem:[#allocation2 + $0x168] sm:$0x1] %vm243_vm2, %v1485_v0  ;;  %259 = vst.msk [vmem:[#allocation2 + $0x180] sm:$0x1] %vm243_vm2, %v1485_v0  ;;  %v292_v17 = vld [vmem:[%s1574_s19 + $0x80] sm:$0xff]  ;;  %v293_v18 = vld [vmem:[%s1574_s19 + $0x88] sm:$0xff] }
  0x18   : > { %260 = vst.msk [vmem:[#allocation2 + $0x29] sm:$0x1] %vm243_vm2, %v1485_v0  ;;  %261 = vst.msk [vmem:[#allocation2 + $0x41] sm:$0x1] %vm243_vm2, %v1485_v0  ;;  %v294_v19 = vld [vmem:[%s1574_s19 + $0x90] sm:$0xff]  ;;  %v295_v20 = vld [vmem:[%s1574_s19 + $0x98] sm:$0xff] }
  0x19   : > { %262 = vst.msk [vmem:[#allocation2 + $0x59] sm:$0x1] %vm243_vm2, %v1485_v0  ;;  %263 = vst.msk [vmem:[#allocation2 + $0x71] sm:$0x1] %vm243_vm2, %v1485_v0  ;;  %v296_v21 = vld [vmem:[%s1574_s19 + $0xa0] sm:$0xff]  ;;  %v297_v23 = vld [vmem:[%s1574_s19 + $0xa8] sm:$0xff] }
  0x1a   : > { %264 = vst.msk [vmem:[#allocation2 + $0x89] sm:$0x1] %vm243_vm2, %v1485_v0  ;;  %265 = vst.msk [vmem:[#allocation2 + $0xa1] sm:$0x1] %vm243_vm2, %v1485_v0  ;;  %v298_v24 = vld [vmem:[%s1574_s19 + $0xb0] sm:$0xff]  ;;  %v299_v25 = vld [vmem:[%s1574_s19 + $0xb8] sm:$0xff] }
  0x1b   : > { %266 = vst.msk [vmem:[#allocation2 + $0xb9] sm:$0x1] %vm243_vm2, %v1485_v0  ;;  %267 = vst.msk [vmem:[#allocation2 + $0xd1] sm:$0x1] %vm243_vm2, %v1485_v0  ;;  %v300_v27 = vld [vmem:[%s1574_s19 + $0xc0] sm:$0xff]  ;;  %v301_v28 = vld [vmem:[%s1574_s19 + $0xc8] sm:$0xff] }
  0x1c   : > { %268 = vst.msk [vmem:[#allocation2 + $0xe9] sm:$0x1] %vm243_vm2, %v1485_v0  ;;  %269 = vst.msk [vmem:[#allocation2 + $0x101] sm:$0x1] %vm243_vm2, %v1485_v0  ;;  %v302_v29 = vld [vmem:[%s1574_s19 + $0xd0] sm:$0xff]  ;;  %v303_v32 = vld [vmem:[%s1574_s19 + $0xd8] sm:$0xff] }
  0x1d   : > { %270 = vst.msk [vmem:[#allocation2 + $0x119] sm:$0x1] %vm243_vm2, %v1485_v0  ;;  %271 = vst.msk [vmem:[#allocation2 + $0x131] sm:$0x1] %vm243_vm2, %v1485_v0  ;;  %v1645_v31 = vld [vmem:[%s2281_s1 + $0x2] ss:$0 sm:$0xff] }
  0x1e   : > { %272 = vst.msk [vmem:[#allocation2 + $0x149] sm:$0x1] %vm243_vm2, %v1485_v0  ;;  %273 = vst.msk [vmem:[#allocation2 + $0x161] sm:$0x1] %vm243_vm2, %v1485_v0  ;;  %v304_v33 = vld [vmem:[%s1574_s19 + $0xe0] sm:$0xff]  ;;  %v305_v34 = vld [vmem:[%s1574_s19 + $0xe8] sm:$0xff] }
  0x1f   : > { %274 = vst.msk [vmem:[#allocation2 + $0x179] sm:$0x1] %vm243_vm2, %v1485_v0  ;;  %275 = vst.msk [vmem:[#allocation2 + $0x191] sm:$0x1] %vm243_vm2, %v1485_v0  ;;  %v306_v35 = vld [vmem:[%s1574_s19 + $0xf0] sm:$0xff]  ;;  %v307_v36 = vld [vmem:[%s1574_s19 + $0xf8] sm:$0xff] }
  0x20   : > { %308 = vst.msk [vmem:[#allocation2 + $0x19] sm:$0xff] %vm233_vm0, %v276_v1  ;;  %309 = vst.msk [vmem:[#allocation2 + $0x21] sm:$0xff] %vm233_vm0, %v277_v2  ;;  %v348_v37 = vld [vmem:[#allocation2] sm:$0xff]  ;;  %v349_v52 = vld [vmem:[#allocation2 + $0x8] sm:$0xff] }
  0x21   : > { %310 = vst.msk [vmem:[#allocation2 + $0x31] sm:$0xff] %vm233_vm0, %v278_v3  ;;  %311 = vst.msk [vmem:[#allocation2 + $0x39] sm:$0xff] %vm233_vm0, %v279_v4  ;;  %v385_v38 = vmul.f32 %v1618_v22, %v348_v37  ;;  %v449_v39 = vld [vmem:[#allocation2 + $0x1] sm:$0xff]  ;;  %v386_v54 = vmul.f32 %v1618_v22, %v349_v52  ;;  %v450_v55 = vld [vmem:[#allocation2 + $0x9] sm:$0xff] }
  0x22   : > { %312 = vst.msk [vmem:[#allocation2 + $0x49] sm:$0xff] %vm233_vm0, %v280_v5  ;;  %313 = vst.msk [vmem:[#allocation2 + $0x51] sm:$0xff] %vm233_vm0, %v281_v6  ;;  %v550_v40 = vld [vmem:[#allocation2 + $0x2] sm:$0xff]  ;;  %v486_v42 = vmul.f32 %v1629_v26, %v449_v39  ;;  %v551_v56 = vld [vmem:[#allocation2 + $0xa] sm:$0xff]  ;;  %v487_v61 = vmul.f32 %v1629_v26, %v450_v55 }
  0x23   : > { %314 = vst.msk [vmem:[#allocation2 + $0x61] sm:$0xff] %vm233_vm0, %v282_v7  ;;  %315 = vst.msk [vmem:[#allocation2 + $0x69] sm:$0xff] %vm233_vm0, %v283_v8  ;;  %v1665_v43 = vld [vmem:[%s2281_s1 + $0x3] ss:$0 sm:$0xff]  ;;  %v1670_v44 = vld [vmem:[%s2281_s1 + $0x4] ss:$0 sm:$0xff]  ;;  %v417_v47 = vadd.f32 %v1640_v30, %v385_v38  ;;  %v587_v48 = vmul.f32 %v1645_v31, %v550_v40  ;;  %v418_v2 = vadd.f32 %v1640_v30, %v386_v54 }
  0x24   : > { %316 = vst.msk [vmem:[#allocation2 + $0x79] sm:$0xff] %vm233_vm0, %v284_v9  ;;  %317 = vst.msk [vmem:[#allocation2 + $0x81] sm:$0xff] %vm233_vm0, %v285_v10  ;;  %v1675_v45 = vld [vmem:[%s2281_s1 + $0x5] ss:$0 sm:$0xff]  ;;  %v1683_v50 = vld [vmem:[%s2281_s1 + $0x6] ss:$0 sm:$0xff]  ;;  %v588_v3 = vmul.f32 %v1645_v31, %v551_v56 }
  0x25   : > { %318 = vst.msk [vmem:[#allocation2 + $0x91] sm:$0xff] %vm233_vm0, %v286_v11  ;;  %319 = vst.msk [vmem:[#allocation2 + $0x99] sm:$0xff] %vm233_vm0, %v287_v12  ;;  %v1688_v51 = vld [vmem:[%s2281_s1 + $0x7] ss:$0 sm:$0xff]  ;;  %v518_v57 = vadd.f32 %v486_v42, %v417_v47  ;;  %v1699_v1 = vld [vmem:[%s2281_s1 + $0x8] ss:$0 sm:$0xff]  ;;  %v519_v12 = vadd.f32 %v487_v61, %v418_v2 }
  0x26   : > { %320 = vst.msk [vmem:[#allocation2 + $0xa9] sm:$0xff] %vm233_vm0, %v288_v13  ;;  %321 = vst.msk [vmem:[#allocation2 + $0xb1] sm:$0xff] %vm233_vm0, %v289_v14 }
  0x27   : > { %322 = vst.msk [vmem:[#allocation2 + $0xc1] sm:$0xff] %vm233_vm0, %v290_v15  ;;  %323 = vst.msk [vmem:[#allocation2 + $0xc9] sm:$0xff] %vm233_vm0, %v291_v16  ;;  %v651_v41 = vld [vmem:[#allocation2 + $0x18] sm:$0xff]  ;;  %v652_v62 = vld [vmem:[#allocation2 + $0x20] sm:$0xff]  ;;  %v619_v4 = vadd.f32 %v587_v48, %v518_v57 }
  0x28   : > { %324 = vst.msk [vmem:[#allocation2 + $0xd9] sm:$0xff] %vm233_vm0, %v292_v17  ;;  %325 = vst.msk [vmem:[#allocation2 + $0xe1] sm:$0xff] %vm233_vm0, %v293_v18  ;;  %v387_v46 = vmul.f32 %v1618_v22, %v651_v41  ;;  %v752_v49 = vld [vmem:[#allocation2 + $0x19] sm:$0xff]  ;;  %v688_v58 = vmul.f32 %v1665_v43, %v651_v41  ;;  %v955_v59 = vld [vmem:[#allocation2 + $0x30] sm:$0xff]  ;;  %v689_v13 = vmul.f32 %v1665_v43, %v652_v62 }
  0x29   : > { %326 = vst.msk [vmem:[#allocation2 + $0xf1] sm:$0xff] %vm233_vm0, %v294_v19  ;;  %327 = vst.msk [vmem:[#allocation2 + $0xf9] sm:$0xff] %vm233_vm0, %v295_v20  ;;  %v853_v53 = vld [vmem:[#allocation2 + $0x1a] sm:$0xff]  ;;  %v1056_v60 = vld [vmem:[#allocation2 + $0x31] sm:$0xff]  ;;  %v789_v5 = vmul.f32 %v1670_v44, %v752_v49  ;;  %v488_v9 = vmul.f32 %v1629_v26, %v752_v49  ;;  %v992_v10 = vmul.f32 %v1683_v50, %v955_v59 }
  0x2a   : > { %328 = vst.msk [vmem:[#allocation2 + $0x109] sm:$0xff] %vm233_vm0, %v296_v21  ;;  %329 = vst.msk [vmem:[#allocation2 + $0x111] sm:$0xff] %vm233_vm0, %v297_v23  ;;  %v419_v63 = vadd.f32 %v1640_v30, %v387_v46  ;;  %v1694_v0 = vld [vmem:[#allocation2 + $0x32] sm:$0xff]  ;;  %v890_v6 = vmul.f32 %v1675_v45, %v853_v53  ;;  %v753_v7 = vld [vmem:[#allocation2 + $0x21] sm:$0xff]  ;;  %v1093_v11 = vmul.f32 %v1688_v51, %v1056_v60 }
  0x2b   : > { %330 = vst.msk [vmem:[#allocation2 + $0x121] sm:$0xff] %vm233_vm0, %v298_v24  ;;  %331 = vst.msk [vmem:[#allocation2 + $0x129] sm:$0xff] %vm233_vm0, %v299_v25  ;;  %v854_v8 = vld [vmem:[#allocation2 + $0x22] sm:$0xff]  ;;  %v956_v14 = vld [vmem:[#allocation2 + $0x38] sm:$0xff]  ;;  %v720_v15 = vadd.f32 %v688_v58, %v619_v4  ;;  %v1194_v16 = vmul.f32 %v1699_v1, %v1694_v0  ;;  %v589_v19 = vmul.f32 %v1645_v31, %v853_v53 }
  0x2c   : > { %332 = vst.msk [vmem:[#allocation2 + $0x139] sm:$0xff] %vm233_vm0, %v300_v27  ;;  %333 = vst.msk [vmem:[#allocation2 + $0x141] sm:$0xff] %vm233_vm0, %v301_v28  ;;  %v1711_v17 = vld [vmem:[#allocation2 + $0x39] sm:$0xff]  ;;  %v520_v18 = vadd.f32 %v488_v9, %v419_v63  ;;  %v620_v20 = vadd.f32 %v588_v3, %v519_v12  ;;  %v790_v21 = vmul.f32 %v1670_v44, %v753_v7  ;;  %v1730_v42 = vld [vmem:[#allocation2 + $0x49] sm:$0xff] }
  0x2d   : > { %334 = vst.msk [vmem:[#allocation2 + $0x151] sm:$0xff] %vm233_vm0, %v302_v29  ;;  %335 = vst.msk [vmem:[#allocation2 + $0x159] sm:$0xff] %vm233_vm0, %v303_v32  ;;  %v891_v23 = vmul.f32 %v1675_v45, %v854_v8  ;;  %v1716_v24 = vld [vmem:[#allocation2 + $0x3a] sm:$0xff]  ;;  %v388_v25 = vmul.f32 %v1618_v22, %v652_v62  ;;  %v821_v27 = vadd.f32 %v789_v5, %v720_v15  ;;  %v1737_v55 = vld [vmem:[#allocation2 + $0x4a] sm:$0xff] }
  0x2e   : > { %336 = vst.msk [vmem:[#allocation2 + $0x169] sm:$0xff] %vm233_vm0, %v304_v33  ;;  %337 = vst.msk [vmem:[#allocation2 + $0x171] sm:$0xff] %vm233_vm0, %v305_v34  ;;  %v993_v28 = vmul.f32 %v1683_v50, %v956_v14  ;;  %v621_v29 = vadd.f32 %v589_v19, %v520_v18  ;;  %v690_v32 = vmul.f32 %v1665_v43, %v955_v59 }
  0x2f   : > { %338 = vst.msk [vmem:[#allocation2 + $0x181] sm:$0xff] %vm233_vm0, %v306_v35  ;;  %339 = vst.msk [vmem:[#allocation2 + $0x189] sm:$0xff] %vm233_vm0, %v307_v36  ;;  %v721_v33 = vadd.f32 %v689_v13, %v620_v20  ;;  %v1094_v34 = vmul.f32 %v1688_v51, %v1711_v17  ;;  %v1723_v35 = vld [vmem:[#allocation2 + $0x48] sm:$0xff]  ;;  %v420_v36 = vadd.f32 %v1640_v30, %v388_v25 }
  0x30   : > { %v489_v37 = vmul.f32 %v1629_v26, %v753_v7  ;;  %v922_v38 = vadd.f32 %v890_v6, %v821_v27  ;;  %v1195_v39 = vmul.f32 %v1699_v1, %v1716_v24  ;;  %v722_v40 = vadd.f32 %v690_v32, %v621_v29  ;;  %v1160_v27 = vld [vmem:[#allocation2 + $0x52] sm:$0xff] }
  0x31   : > { %v791_v41 = vmul.f32 %v1670_v44, %v1056_v60  ;;  %v822_v46 = vadd.f32 %v790_v21, %v721_v33  ;;  %v892_v47 = vmul.f32 %v1675_v45, %v1694_v0  ;;  %v590_v49 = vmul.f32 %v1645_v31, %v854_v8  ;;  %v958_v8 = vld [vmem:[#allocation2 + $0x50] sm:$0xff] }
  0x32   : > { %v521_v48 = vadd.f32 %v489_v37, %v420_v36  ;;  %v1024_v52 = vadd.f32 %v992_v10, %v922_v38  ;;  %v994_v54 = vmul.f32 %v1683_v50, %v1723_v35  ;;  %v389_v56 = vmul.f32 %v1618_v22, %v955_v59  ;;  %v1059_v21 = vld [vmem:[#allocation2 + $0x51] sm:$0xff]  ;;  %v1060_v38 = vld [vmem:[#allocation2 + $0x61] sm:$0xff] }
  0x33   : > { %v823_v53 = vadd.f32 %v791_v41, %v722_v40  ;;  %v923_v57 = vadd.f32 %v891_v23, %v822_v46  ;;  %v1095_v58 = vmul.f32 %v1688_v51, %v1730_v42  ;;  %v691_v62 = vmul.f32 %v1665_v43, %v956_v14 }
  0x34   : > { %v622_v61 = vadd.f32 %v590_v49, %v521_v48  ;;  %v1125_v63 = vadd.f32 %v1093_v11, %v1024_v52  ;;  %v421_v3 = vadd.f32 %v1640_v30, %v389_v56  ;;  %v490_v4 = vmul.f32 %v1629_v26, %v1056_v60 }
  0x35   : > { %v924_v2 = vadd.f32 %v892_v47, %v823_v53  ;;  %v1025_v59 = vadd.f32 %v993_v28, %v923_v57  ;;  %v1196_v5 = vmul.f32 %v1699_v1, %v1737_v55  ;;  %v792_v7 = vmul.f32 %v1670_v44, %v1711_v17  ;;  %v1781_v47 = vld [vmem:[#allocation2 + $0x62] sm:$0xff] }
  0x36   : > { %v723_v6 = vadd.f32 %v691_v62, %v622_v61  ;;  %v1226_v9 = vadd.f32 %v1194_v16, %v1125_v63  ;;  %v522_v11 = vadd.f32 %v490_v4, %v421_v3  ;;  %v591_v60 = vmul.f32 %v1645_v31, %v1694_v0  ;;  %v960_v57 = vld [vmem:[#allocation2 + $0x68] sm:$0xff] }
  0x37   : > { %v1026_v10 = vadd.f32 %v994_v54, %v924_v2  ;;  %v1126_v12 = vadd.f32 %v1094_v34, %v1025_v59  ;;  %v893_v15 = vmul.f32 %v1675_v45, %v1716_v24  ;;  %v390_v18 = vmul.f32 %v1618_v22, %v956_v14  ;;  %v959_v34 = vld [vmem:[#allocation2 + $0x60] sm:$0xff]  ;;  %v1061_v4 = vld [vmem:[#allocation2 + $0x69] sm:$0xff] }
  0x38   : > { %v824_v13 = vadd.f32 %v792_v7, %v723_v6  ;;  %1258 = vst.msk [vmem:[%s1750_s20] sm:$0xff] %vm233_vm0, %v1226_v9  ;;  %v995_v20 = vmul.f32 %v1683_v50, %v958_v8  ;;  %v623_v16 = vadd.f32 %v591_v60, %v522_v11  ;;  %v692_v23 = vmul.f32 %v1665_v43, %v1723_v35  ;;  %v1794_v59 = vld [vmem:[#allocation2 + $0x6a] sm:$0xff] }
  0x39   : > { %v1127_v19 = vadd.f32 %v1095_v58, %v1026_v10  ;;  %v1227_v0 = vadd.f32 %v1195_v39, %v1126_v12  ;;  %v422_v28 = vadd.f32 %v1640_v30, %v390_v18  ;;  %v491_v14 = vmul.f32 %v1629_v26, %v1711_v17 }
  0x3a   : > { %v925_v25 = vadd.f32 %v893_v15, %v824_v13  ;;  %v724_v32 = vadd.f32 %v692_v23, %v623_v16  ;;  %v793_v33 = vmul.f32 %v1670_v44, %v1730_v42  ;;  %v1096_v37 = vmul.f32 %v1688_v51, %v1059_v21  ;;  %v961_v13 = vld [vmem:[#allocation2 + $0x78] sm:$0xff] }
  0x3b   : > { %v1228_v29 = vadd.f32 %v1196_v5, %v1127_v19  ;;  %1259 = vst.msk [vmem:[%s1750_s20 + $0x8] sm:$0xff] %vm233_vm0, %v1227_v0  ;;  %v523_v39 = vadd.f32 %v491_v14, %v422_v28  ;;  %v592_v40 = vmul.f32 %v1645_v31, %v1716_v24  ;;  %v1197_v17 = vmul.f32 %v1699_v1, %v1160_v27  ;;  %v1062_v16 = vld [vmem:[#allocation2 + $0x79] sm:$0xff] }
  0x3c   : > { %v1027_v36 = vadd.f32 %v995_v20, %v925_v25  ;;  %v825_v41 = vadd.f32 %v793_v33, %v724_v32  ;;  %v894_v46 = vmul.f32 %v1675_v45, %v1737_v55  ;;  %v391_v48 = vmul.f32 %v1618_v22, %v1723_v35  ;;  %v1810_v25 = vld [vmem:[#allocation2 + $0x7a] sm:$0xff] }
  0x3d   : > { %1260 = vst.msk [vmem:[%s1750_s20 + $0x10] sm:$0xff] %vm233_vm0, %v1228_v29  ;;  %v996_v52 = vmul.f32 %v1683_v50, %v959_v34  ;;  %v624_v53 = vadd.f32 %v592_v40, %v523_v39  ;;  %v693_v54 = vmul.f32 %v1665_v43, %v958_v8  ;;  %v1097_v56 = vmul.f32 %v1688_v51, %v1060_v38 }
  0x3e   : > { %v1128_v49 = vadd.f32 %v1096_v37, %v1027_v36  ;;  %v926_v24 = vadd.f32 %v894_v46, %v825_v41  ;;  %v423_v58 = vadd.f32 %v1640_v30, %v391_v48  ;;  %v492_v61 = vmul.f32 %v1629_v26, %v1730_v42  ;;  %v962_v41 = vld [vmem:[#allocation2 + $0x80] sm:$0xff] }
  0x3f   : > { %v1198_v35 = vmul.f32 %v1699_v1, %v1781_v47  ;;  %v725_v63 = vadd.f32 %v693_v54, %v624_v53  ;;  %v794_v2 = vmul.f32 %v1670_v44, %v1059_v21  ;;  %v593_v6 = vmul.f32 %v1645_v31, %v1737_v55  ;;  %v1823_v46 = vld [vmem:[#allocation2 + $0x81] sm:$0xff] }
  0x40   : > { %v1229_v62 = vadd.f32 %v1197_v17, %v1128_v49  ;;  %v1028_v3 = vadd.f32 %v996_v52, %v926_v24  ;;  %v524_v5 = vadd.f32 %v492_v61, %v423_v58  ;;  %v392_v7 = vmul.f32 %v1618_v22, %v958_v8 }
  0x41   : > { %v826_v42 = vadd.f32 %v794_v2, %v725_v63  ;;  %v895_v9 = vmul.f32 %v1675_v45, %v1160_v27  ;;  %v997_v10 = vmul.f32 %v1683_v50, %v960_v57  ;;  %v694_v11 = vmul.f32 %v1665_v43, %v959_v34 }
  0x42   : > { %1261 = vst.msk [vmem:[%s1750_s20 + $0x18] sm:$0xff] %vm233_vm0, %v1229_v62  ;;  %v1129_v60 = vadd.f32 %v1097_v56, %v1028_v3  ;;  %v625_v12 = vadd.f32 %v593_v6, %v524_v5  ;;  %v424_v15 = vadd.f32 %v1640_v30, %v392_v7  ;;  %v493_v18 = vmul.f32 %v1629_v26, %v1059_v21  ;;  %v1830_v56 = vld [vmem:[#allocation2 + $0x82] sm:$0xff] }
  0x43   : > { %v927_v55 = vadd.f32 %v895_v9, %v826_v42  ;;  %v1098_v8 = vmul.f32 %v1688_v51, %v1061_v4  ;;  %v1199_v19 = vmul.f32 %v1699_v1, %v1794_v59  ;;  %v795_v20 = vmul.f32 %v1670_v44, %v1060_v38 }
  0x44   : > { %v1230_v23 = vadd.f32 %v1198_v35, %v1129_v60  ;;  %v726_v0 = vadd.f32 %v694_v11, %v625_v12  ;;  %v525_v28 = vadd.f32 %v493_v18, %v424_v15  ;;  %v594_v14 = vmul.f32 %v1645_v31, %v1160_v27  ;;  %v963_v11 = vld [vmem:[#allocation2 + $0x90] sm:$0xff] }
  0x45   : > { %v1029_v29 = vadd.f32 %v997_v10, %v927_v55  ;;  %v896_v21 = vmul.f32 %v1675_v45, %v1781_v47  ;;  %v998_v32 = vmul.f32 %v1683_v50, %v961_v13  ;;  %v393_v33 = vmul.f32 %v1618_v22, %v959_v34  ;;  %v1064_v60 = vld [vmem:[#allocation2 + $0x91] sm:$0xff] }
  0x46   : > { %1262 = vst.msk [vmem:[%s1750_s20 + $0x20] sm:$0xff] %vm233_vm0, %v1230_v23  ;;  %v827_v36 = vadd.f32 %v795_v20, %v726_v0  ;;  %v1099_v37 = vmul.f32 %v1688_v51, %v1062_v16  ;;  %v626_v39 = vadd.f32 %v594_v14, %v525_v28  ;;  %v695_v40 = vmul.f32 %v1665_v43, %v960_v57  ;;  %v1165_v23 = vld [vmem:[#allocation2 + $0x92] sm:$0xff] }
  0x47   : > { %v1130_v17 = vadd.f32 %v1098_v8, %v1029_v29  ;;  %v1200_v27 = vmul.f32 %v1699_v1, %v1810_v25  ;;  %v425_v48 = vadd.f32 %v1640_v30, %v393_v33  ;;  %v494_v34 = vmul.f32 %v1629_v26, %v1060_v38 }
  0x48   : > { %v928_v49 = vadd.f32 %v896_v21, %v827_v36  ;;  %v727_v52 = vadd.f32 %v695_v40, %v626_v39  ;;  %v796_v53 = vmul.f32 %v1670_v44, %v1061_v4  ;;  %v897_v54 = vmul.f32 %v1675_v45, %v1794_v59  ;;  %v964_v36 = vld [vmem:[#allocation2 + $0x98] sm:$0xff] }
  0x49   : > { %v1231_v24 = vadd.f32 %v1199_v19, %v1130_v17  ;;  %v526_v58 = vadd.f32 %v494_v34, %v425_v48  ;;  %v595_v61 = vmul.f32 %v1645_v31, %v1781_v47  ;;  %v394_v62 = vmul.f32 %v1618_v22, %v960_v57 }
  0x4a   : > { %v1030_v35 = vadd.f32 %v998_v32, %v928_v49  ;;  %v828_v63 = vadd.f32 %v796_v53, %v727_v52  ;;  %v999_v38 = vmul.f32 %v1683_v50, %v962_v41  ;;  %v1100_v2 = vmul.f32 %v1688_v51, %v1823_v46  ;;  %v1166_v52 = vld [vmem:[#allocation2 + $0x9a] sm:$0xff] }
  0x4b   : > { %1263 = vst.msk [vmem:[%s1750_s20 + $0x28] sm:$0xff] %vm233_vm0, %v1231_v24  ;;  %v627_v3 = vadd.f32 %v595_v61, %v526_v58  ;;  %v696_v5 = vmul.f32 %v1665_v43, %v961_v13  ;;  %v426_v6 = vadd.f32 %v1640_v30, %v394_v62  ;;  %v495_v7 = vmul.f32 %v1629_v26, %v1061_v4 }
  0x4c   : > { %v1131_v42 = vadd.f32 %v1099_v37, %v1030_v35  ;;  %v929_v47 = vadd.f32 %v897_v54, %v828_v63  ;;  %v1201_v57 = vmul.f32 %v1699_v1, %v1830_v56  ;;  %v797_v9 = vmul.f32 %v1670_v44, %v1062_v16  ;;  %v1065_v37 = vld [vmem:[#allocation2 + $0x99] sm:$0xff] }
  0x4d   : > { %v728_v10 = vadd.f32 %v696_v5, %v627_v3  ;;  %v527_v12 = vadd.f32 %v495_v7, %v426_v6  ;;  %v596_v15 = vmul.f32 %v1645_v31, %v1794_v59  ;;  %v395_v18 = vmul.f32 %v1618_v22, %v961_v13  ;;  %v1066_v3 = vld [vmem:[#allocation2 + $0xa9] sm:$0xff] }
  0x4e   : > { %v1232_v55 = vadd.f32 %v1200_v27, %v1131_v42  ;;  %v1031_v8 = vadd.f32 %v999_v38, %v929_v47  ;;  %v898_v4 = vmul.f32 %v1675_v45, %v1810_v25  ;;  %v697_v19 = vmul.f32 %v1665_v43, %v962_v41 }
  0x4f   : > { %v829_v20 = vadd.f32 %v797_v9, %v728_v10  ;;  %v628_v0 = vadd.f32 %v596_v15, %v527_v12  ;;  %v427_v28 = vadd.f32 %v1640_v30, %v395_v18  ;;  %v496_v14 = vmul.f32 %v1629_v26, %v1062_v16  ;;  %v1167_v9 = vld [vmem:[#allocation2 + $0xaa] sm:$0xff] }
  0x50   : > { %1264 = vst.msk [vmem:[%s1750_s20 + $0x30] sm:$0xff] %vm233_vm0, %v1232_v55  ;;  %v1132_v29 = vadd.f32 %v1100_v2, %v1031_v8  ;;  %v1000_v59 = vmul.f32 %v1683_v50, %v963_v11  ;;  %v1101_v13 = vmul.f32 %v1688_v51, %v1064_v60  ;;  %v798_v21 = vmul.f32 %v1670_v44, %v1823_v46  ;;  %v965_v2 = vld [vmem:[#allocation2 + $0xa8] sm:$0xff] }
  0x51   : > { %v930_v32 = vadd.f32 %v898_v4, %v829_v20  ;;  %v729_v33 = vadd.f32 %v697_v19, %v628_v0  ;;  %v528_v39 = vadd.f32 %v496_v14, %v427_v28  ;;  %v597_v40 = vmul.f32 %v1645_v31, %v1810_v25  ;;  %v966_v20 = vld [vmem:[#allocation2 + $0xb0] sm:$0xff] }
  0x52   : > { %v1233_v16 = vadd.f32 %v1201_v57, %v1132_v29  ;;  %v1202_v17 = vmul.f32 %v1699_v1, %v1165_v23  ;;  %v899_v27 = vmul.f32 %v1675_v45, %v1830_v56  ;;  %v396_v48 = vmul.f32 %v1618_v22, %v962_v41 }
  0x53   : > { %v1032_v34 = vadd.f32 %v1000_v59, %v930_v32  ;;  %v830_v49 = vadd.f32 %v798_v21, %v729_v33  ;;  %v629_v53 = vadd.f32 %v597_v40, %v528_v39  ;;  %v698_v54 = vmul.f32 %v1665_v43, %v963_v11  ;;  %v1067_v59 = vld [vmem:[#allocation2 + $0xb1] sm:$0xff] }
  0x54   : > { %1265 = vst.msk [vmem:[%s1750_s20 + $0x38] sm:$0xff] %vm233_vm0, %v1233_v16  ;;  %v1001_v24 = vmul.f32 %v1683_v50, %v964_v36  ;;  %v1102_v25 = vmul.f32 %v1688_v51, %v1065_v37  ;;  %v428_v58 = vadd.f32 %v1640_v30, %v396_v48  ;;  %v497_v61 = vmul.f32 %v1629_v26, %v1823_v46  ;;  %v1168_v33 = vld [vmem:[#allocation2 + $0xb2] sm:$0xff] }
  0x55   : > { %v1133_v62 = vadd.f32 %v1101_v13, %v1032_v34  ;;  %v931_v35 = vadd.f32 %v899_v27, %v830_v49  ;;  %v730_v41 = vadd.f32 %v698_v54, %v629_v53  ;;  %v799_v63 = vmul.f32 %v1670_v44, %v1064_v60  ;;  %v967_v53 = vld [vmem:[#allocation2 + $0xc0] sm:$0xff] }
  0x56   : > { %v1203_v38 = vmul.f32 %v1699_v1, %v1166_v52  ;;  %v529_v5 = vadd.f32 %v497_v61, %v428_v58  ;;  %v598_v6 = vmul.f32 %v1645_v31, %v1830_v56  ;;  %v397_v7 = vmul.f32 %v1618_v22, %v963_v11  ;;  %v1900_v54 = vld [vmem:[#allocation2 + $0xc1] sm:$0xff] }
  0x57   : > { %v1234_v42 = vadd.f32 %v1202_v17, %v1133_v62  ;;  %v1033_v47 = vadd.f32 %v1001_v24, %v931_v35  ;;  %v831_v57 = vadd.f32 %v799_v63, %v730_v41  ;;  %v900_v46 = vmul.f32 %v1675_v45, %v1165_v23  ;;  %v1905_v41 = vld [vmem:[#allocation2 + $0xc2] sm:$0xff] }
  0x58   : > { %v630_v10 = vadd.f32 %v598_v6, %v529_v5  ;;  %v699_v12 = vmul.f32 %v1665_v43, %v964_v36  ;;  %v429_v15 = vadd.f32 %v1640_v30, %v397_v7  ;;  %v498_v18 = vmul.f32 %v1629_v26, %v1064_v60 }
  0x59   : > { %1266 = vst.msk [vmem:[%s1750_s20 + $0x40] sm:$0xff] %vm233_vm0, %v1234_v42  ;;  %v1134_v55 = vadd.f32 %v1102_v25, %v1033_v47  ;;  %v932_v8 = vadd.f32 %v900_v46, %v831_v57  ;;  %v1002_v56 = vmul.f32 %v1683_v50, %v965_v2  ;;  %v1103_v11 = vmul.f32 %v1688_v51, %v1066_v3  ;;  %v968_v47 = vld [vmem:[#allocation2 + $0xc8] sm:$0xff] }
  0x5a   : > { %v731_v4 = vadd.f32 %v699_v12, %v630_v10  ;;  %v800_v19 = vmul.f32 %v1670_v44, %v1065_v37  ;;  %v530_v0 = vadd.f32 %v498_v18, %v429_v15  ;;  %v599_v28 = vmul.f32 %v1645_v31, %v1165_v23 }
  0x5b   : > { %v1235_v14 = vadd.f32 %v1203_v38, %v1134_v55  ;;  %v1034_v29 = vadd.f32 %v1002_v56, %v932_v8  ;;  %v1204_v60 = vmul.f32 %v1699_v1, %v1167_v9  ;;  %v398_v13 = vmul.f32 %v1618_v22, %v964_v36  ;;  %v1069_v8 = vld [vmem:[#allocation2 + $0xc9] sm:$0xff] }
  0x5c   : > { %v832_v21 = vadd.f32 %v800_v19, %v731_v4  ;;  %v901_v32 = vmul.f32 %v1675_v45, %v1166_v52  ;;  %v631_v39 = vadd.f32 %v599_v28, %v530_v0  ;;  %v700_v40 = vmul.f32 %v1665_v43, %v965_v2  ;;  %v1920_v56 = vld [vmem:[#allocation2 + $0xca] sm:$0xff] }
  0x5d   : > { %1267 = vst.msk [vmem:[%s1750_s20 + $0x48] sm:$0xff] %vm233_vm0, %v1235_v14  ;;  %v1135_v16 = vadd.f32 %v1103_v11, %v1034_v29  ;;  %v1003_v17 = vmul.f32 %v1683_v50, %v966_v20  ;;  %v430_v23 = vadd.f32 %v1640_v30, %v398_v13  ;;  %v499_v27 = vmul.f32 %v1629_v26, %v1065_v37 }
  0x5e   : > { %v933_v48 = vadd.f32 %v901_v32, %v832_v21  ;;  %v1104_v36 = vmul.f32 %v1688_v51, %v1067_v59  ;;  %v732_v34 = vadd.f32 %v700_v40, %v631_v39  ;;  %v801_v49 = vmul.f32 %v1670_v44, %v1066_v3  ;;  %v1070_v40 = vld [vmem:[#allocation2 + $0xd9] sm:$0xff] }
  0x5f   : > { %v1236_v24 = vadd.f32 %v1204_v60, %v1135_v16  ;;  %v1205_v25 = vmul.f32 %v1699_v1, %v1168_v33  ;;  %v531_v58 = vadd.f32 %v499_v27, %v430_v23  ;;  %v600_v61 = vmul.f32 %v1645_v31, %v1166_v52  ;;  %v1935_v23 = vld [vmem:[#allocation2 + $0xda] sm:$0xff] }
  0x60   : > { %v1035_v62 = vadd.f32 %v1003_v17, %v933_v48  ;;  %v833_v35 = vadd.f32 %v801_v49, %v732_v34  ;;  %v902_v37 = vmul.f32 %v1675_v45, %v1167_v9  ;;  %v399_v63 = vmul.f32 %v1618_v22, %v965_v2 }
  0x61   : > { %1268 = vst.msk [vmem:[%s1750_s20 + $0x50] sm:$0xff] %vm233_vm0, %v1236_v24  ;;  %v1004_v38 = vmul.f32 %v1683_v50, %v967_v53  ;;  %v1105_v5 = vmul.f32 %v1688_v51, %v1900_v54  ;;  %v632_v6 = vadd.f32 %v600_v61, %v531_v58  ;;  %v701_v7 = vmul.f32 %v1665_v43, %v966_v20 }
  0x62   : > { %v1136_v42 = vadd.f32 %v1104_v36, %v1035_v62  ;;  %v934_v52 = vadd.f32 %v902_v37, %v833_v35  ;;  %v431_v57 = vadd.f32 %v1640_v30, %v399_v63  ;;  %v500_v46 = vmul.f32 %v1629_v26, %v1066_v3  ;;  %v970_v35 = vld [vmem:[#allocation2 + $0xe0] sm:$0xff] }
  0x63   : > { %v1206_v2 = vmul.f32 %v1699_v1, %v1905_v41  ;;  %v733_v10 = vadd.f32 %v701_v7, %v632_v6  ;;  %v802_v12 = vmul.f32 %v1670_v44, %v1067_v59  ;;  %v601_v15 = vmul.f32 %v1645_v31, %v1167_v9  ;;  %v969_v9 = vld [vmem:[#allocation2 + $0xd8] sm:$0xff]  ;;  %v1948_v37 = vld [vmem:[#allocation2 + $0xe1] sm:$0xff] }
  0x64   : > { %v1237_v18 = vadd.f32 %v1205_v25, %v1136_v42  ;;  %v1036_v55 = vadd.f32 %v1004_v38, %v934_v52  ;;  %v532_v11 = vadd.f32 %v500_v46, %v431_v57  ;;  %v400_v4 = vmul.f32 %v1618_v22, %v966_v20  ;;  %v1956_v52 = vld [vmem:[#allocation2 + $0xe2] sm:$0xff] }
  0x65   : > { %v834_v19 = vadd.f32 %v802_v12, %v733_v10  ;;  %v903_v0 = vmul.f32 %v1675_v45, %v1168_v33  ;;  %v1005_v3 = vmul.f32 %v1683_v50, %v968_v47  ;;  %v702_v28 = vmul.f32 %v1665_v43, %v967_v53 }
  0x66   : > { %1269 = vst.msk [vmem:[%s1750_s20 + $0x58] sm:$0xff] %vm233_vm0, %v1237_v18  ;;  %v1137_v14 = vadd.f32 %v1105_v5, %v1036_v55  ;;  %v633_v29 = vadd.f32 %v601_v15, %v532_v11  ;;  %v432_v60 = vadd.f32 %v1640_v30, %v400_v4  ;;  %v501_v13 = vmul.f32 %v1629_v26, %v1067_v59 }
  0x67   : > { %v935_v21 = vadd.f32 %v903_v0, %v834_v19  ;;  %v1106_v20 = vmul.f32 %v1688_v51, %v1069_v8  ;;  %v1207_v32 = vmul.f32 %v1699_v1, %v1920_v56  ;;  %v803_v39 = vmul.f32 %v1670_v44, %v1900_v54 }
  0x68   : > { %v1238_v16 = vadd.f32 %v1206_v2, %v1137_v14  ;;  %v734_v17 = vadd.f32 %v702_v28, %v633_v29  ;;  %v533_v27 = vadd.f32 %v501_v13, %v432_v60  ;;  %v602_v48 = vmul.f32 %v1645_v31, %v1168_v33  ;;  %v971_v28 = vld [vmem:[#allocation2 + $0xf0] sm:$0xff] }
  0x69   : > { %v1037_v36 = vadd.f32 %v1005_v3, %v935_v21  ;;  %v904_v59 = vmul.f32 %v1675_v45, %v1905_v41  ;;  %v1006_v34 = vmul.f32 %v1683_v50, %v969_v9  ;;  %v401_v49 = vmul.f32 %v1618_v22, %v967_v53  ;;  %v1072_v14 = vld [vmem:[#allocation2 + $0xf1] sm:$0xff] }
  0x6a   : > { %1270 = vst.msk [vmem:[%s1750_s20 + $0x60] sm:$0xff] %vm233_vm0, %v1238_v16  ;;  %v835_v24 = vadd.f32 %v803_v39, %v734_v17  ;;  %v1107_v25 = vmul.f32 %v1688_v51, %v1070_v40  ;;  %v634_v58 = vadd.f32 %v602_v48, %v533_v27  ;;  %v703_v61 = vmul.f32 %v1665_v43, %v968_v47  ;;  %v1173_v16 = vld [vmem:[#allocation2 + $0xf2] sm:$0xff] }
  0x6b   : > { %v1138_v62 = vadd.f32 %v1106_v20, %v1037_v36  ;;  %v1208_v33 = vmul.f32 %v1699_v1, %v1935_v23  ;;  %v433_v63 = vadd.f32 %v1640_v30, %v401_v49  ;;  %v502_v53 = vmul.f32 %v1629_v26, %v1900_v54 }
  0x6c   : > { %v936_v38 = vadd.f32 %v904_v59, %v835_v24  ;;  %v735_v5 = vadd.f32 %v703_v61, %v634_v58  ;;  %v804_v6 = vmul.f32 %v1670_v44, %v1069_v8  ;;  %v905_v7 = vmul.f32 %v1675_v45, %v1920_v56  ;;  %v972_v24 = vld [vmem:[#allocation2 + $0xf8] sm:$0xff] }
  0x6d   : > { %v1239_v42 = vadd.f32 %v1207_v32, %v1138_v62  ;;  %v534_v57 = vadd.f32 %v502_v53, %v433_v63  ;;  %v603_v46 = vmul.f32 %v1645_v31, %v1905_v41  ;;  %v402_v2 = vmul.f32 %v1618_v22, %v968_v47 }
  0x6e   : > { %v1038_v10 = vadd.f32 %v1006_v34, %v936_v38  ;;  %v836_v12 = vadd.f32 %v804_v6, %v735_v5  ;;  %v1007_v54 = vmul.f32 %v1683_v50, %v970_v35  ;;  %v1108_v15 = vmul.f32 %v1688_v51, %v1948_v37  ;;  %v1174_v5 = vld [vmem:[#allocation2 + $0xfa] sm:$0xff] }
  0x6f   : > { %1271 = vst.msk [vmem:[%s1750_s20 + $0x68] sm:$0xff] %vm233_vm0, %v1239_v42  ;;  %v635_v18 = vadd.f32 %v603_v46, %v534_v57  ;;  %v704_v55 = vmul.f32 %v1665_v43, %v969_v9  ;;  %v434_v11 = vadd.f32 %v1640_v30, %v402_v2  ;;  %v503_v4 = vmul.f32 %v1629_v26, %v1069_v8 }
  0x70   : > { %v1139_v19 = vadd.f32 %v1107_v25, %v1038_v10  ;;  %v937_v41 = vadd.f32 %v905_v7, %v836_v12  ;;  %v1209_v47 = vmul.f32 %v1699_v1, %v1956_v52  ;;  %v805_v0 = vmul.f32 %v1670_v44, %v1070_v40  ;;  %v1073_v25 = vld [vmem:[#allocation2 + $0xf9] sm:$0xff] }
  0x71   : > { %v736_v3 = vadd.f32 %v704_v55, %v635_v18  ;;  %v535_v29 = vadd.f32 %v503_v4, %v434_v11  ;;  %v604_v60 = vmul.f32 %v1645_v31, %v1920_v56  ;;  %v403_v13 = vmul.f32 %v1618_v22, %v969_v9  ;;  %v1074_v18 = vld [vmem:[#allocation2 + $0x109] sm:$0xff] }
  0x72   : > { %v1240_v21 = vadd.f32 %v1208_v33, %v1139_v19  ;;  %v1039_v20 = vadd.f32 %v1007_v54, %v937_v41  ;;  %v906_v8 = vmul.f32 %v1675_v45, %v1935_v23  ;;  %v705_v32 = vmul.f32 %v1665_v43, %v970_v35 }
  0x73   : > { %v837_v39 = vadd.f32 %v805_v0, %v736_v3  ;;  %v636_v17 = vadd.f32 %v604_v60, %v535_v29  ;;  %v435_v27 = vadd.f32 %v1640_v30, %v403_v13  ;;  %v504_v48 = vmul.f32 %v1629_v26, %v1070_v40  ;;  %v1175_v0 = vld [vmem:[#allocation2 + $0x10a] sm:$0xff] }
  0x74   : > { %1272 = vst.msk [vmem:[%s1750_s20 + $0x70] sm:$0xff] %vm233_vm0, %v1240_v21  ;;  %v1140_v36 = vadd.f32 %v1108_v15, %v1039_v20  ;;  %v1008_v56 = vmul.f32 %v1683_v50, %v971_v28  ;;  %v1109_v9 = vmul.f32 %v1688_v51, %v1072_v14  ;;  %v806_v59 = vmul.f32 %v1670_v44, %v1948_v37  ;;  %v973_v15 = vld [vmem:[#allocation2 + $0x108] sm:$0xff] }
  0x75   : > { %v938_v34 = vadd.f32 %v906_v8, %v837_v39  ;;  %v737_v49 = vadd.f32 %v705_v32, %v636_v17  ;;  %v536_v58 = vadd.f32 %v504_v48, %v435_v27  ;;  %v605_v61 = vmul.f32 %v1645_v31, %v1935_v23  ;;  %v974_v39 = vld [vmem:[#allocation2 + $0x110] sm:$0xff] }
  0x76   : > { %v1241_v40 = vadd.f32 %v1209_v47, %v1140_v36  ;;  %v1210_v62 = vmul.f32 %v1699_v1, %v1173_v16  ;;  %v907_v33 = vmul.f32 %v1675_v45, %v1956_v52  ;;  %v404_v63 = vmul.f32 %v1618_v22, %v970_v35 }
  0x77   : > { %v1040_v53 = vadd.f32 %v1008_v56, %v938_v34  ;;  %v838_v38 = vadd.f32 %v806_v59, %v737_v49  ;;  %v637_v6 = vadd.f32 %v605_v61, %v536_v58  ;;  %v706_v7 = vmul.f32 %v1665_v43, %v971_v28  ;;  %v1075_v56 = vld [vmem:[#allocation2 + $0x111] sm:$0xff] }
  0x78   : > { %1273 = vst.msk [vmem:[%s1750_s20 + $0x78] sm:$0xff] %vm233_vm0, %v1241_v40  ;;  %v1009_v42 = vmul.f32 %v1683_v50, %v972_v24  ;;  %v1110_v23 = vmul.f32 %v1688_v51, %v1073_v25  ;;  %v436_v57 = vadd.f32 %v1640_v30, %v404_v63  ;;  %v505_v46 = vmul.f32 %v1629_v26, %v1948_v37  ;;  %v2018_v49 = vld [vmem:[#allocation2 + $0x112] sm:$0xff] }
  0x79   : > { %v1141_v2 = vadd.f32 %v1109_v9, %v1040_v53  ;;  %v939_v10 = vadd.f32 %v907_v33, %v838_v38  ;;  %v738_v35 = vadd.f32 %v706_v7, %v637_v6  ;;  %v807_v12 = vmul.f32 %v1670_v44, %v1072_v14  ;;  %v975_v6 = vld [vmem:[#allocation2 + $0x120] sm:$0xff] }
  0x7a   : > { %v1211_v54 = vmul.f32 %v1699_v1, %v1174_v5  ;;  %v537_v55 = vadd.f32 %v505_v46, %v436_v57  ;;  %v606_v11 = vmul.f32 %v1645_v31, %v1956_v52  ;;  %v405_v4 = vmul.f32 %v1618_v22, %v971_v28  ;;  %v2028_v7 = vld [vmem:[#allocation2 + $0x121] sm:$0xff] }
  0x7b   : > { %v1242_v19 = vadd.f32 %v1210_v62, %v1141_v2  ;;  %v1041_v41 = vadd.f32 %v1009_v42, %v939_v10  ;;  %v839_v47 = vadd.f32 %v807_v12, %v738_v35  ;;  %v908_v37 = vmul.f32 %v1675_v45, %v1173_v16  ;;  %v2034_v35 = vld [vmem:[#allocation2 + $0x122] sm:$0xff] }
  0x7c   : > { %v638_v3 = vadd.f32 %v606_v11, %v537_v55  ;;  %v707_v29 = vmul.f32 %v1665_v43, %v972_v24  ;;  %v437_v60 = vadd.f32 %v1640_v30, %v405_v4  ;;  %v506_v13 = vmul.f32 %v1629_v26, %v1072_v14 }
  0x7d   : > { %1274 = vst.msk [vmem:[%s1750_s20 + $0x80] sm:$0xff] %vm233_vm0, %v1242_v19  ;;  %v1142_v21 = vadd.f32 %v1110_v23, %v1041_v41  ;;  %v940_v20 = vadd.f32 %v908_v37, %v839_v47  ;;  %v1010_v52 = vmul.f32 %v1683_v50, %v973_v15  ;;  %v1111_v28 = vmul.f32 %v1688_v51, %v1074_v18  ;;  %v2043_v41 = vld [vmem:[#allocation2 + $0x128] sm:$0xff] }
  0x7e   : > { %v739_v8 = vadd.f32 %v707_v29, %v638_v3  ;;  %v808_v32 = vmul.f32 %v1670_v44, %v1073_v25  ;;  %v538_v17 = vadd.f32 %v506_v13, %v437_v60  ;;  %v607_v27 = vmul.f32 %v1645_v31, %v1173_v16 }
  0x7f   : > { %v1243_v48 = vadd.f32 %v1211_v54, %v1142_v21  ;;  %v1042_v36 = vadd.f32 %v1010_v52, %v940_v20  ;;  %v1212_v14 = vmul.f32 %v1699_v1, %v1175_v0  ;;  %v406_v9 = vmul.f32 %v1618_v22, %v972_v24  ;;  %v2051_v21 = vld [vmem:[#allocation2 + $0x129] sm:$0xff] }
  0x80   : > { %v840_v59 = vadd.f32 %v808_v32, %v739_v8  ;;  %v909_v34 = vmul.f32 %v1675_v45, %v1174_v5  ;;  %v639_v58 = vadd.f32 %v607_v27, %v538_v17  ;;  %v708_v61 = vmul.f32 %v1665_v43, %v973_v15  ;;  %v2053_v20 = vld [vmem:[#allocation2 + $0x12a] sm:$0xff]  ;;  %v2068_v17 = vld [vmem:[#allocation2 + $0x138] sm:$0xff]  ;;  %v2073_v27 = vld [vmem:[%s2282_s2] ss:$0 sm:$0xff] }
  0x81   : > { %1275 = vst.msk [vmem:[%s1750_s20 + $0x88] sm:$0xff] %vm233_vm0, %v1243_v48  ;;  %v1143_v40 = vadd.f32 %v1111_v28, %v1042_v36  ;;  %v1011_v16 = vmul.f32 %v1683_v50, %v974_v39  ;;  %v438_v62 = vadd.f32 %v1640_v30, %v406_v9  ;;  %v507_v33 = vmul.f32 %v1629_v26, %v1073_v25  ;;  %v2079_v48 = vld [vmem:[%s2281_s1 + $0x1] ss:$0 sm:$0xff] }
  0x82   : > { %v941_v63 = vadd.f32 %v909_v34, %v840_v59  ;;  %v1112_v24 = vmul.f32 %v1688_v51, %v1075_v56  ;;  %v740_v53 = vadd.f32 %v708_v61, %v639_v58  ;;  %v809_v38 = vmul.f32 %v1670_v44, %v1074_v18  ;;  %v2088_v34 = vld [vmem:[#allocation2 + $0x139] sm:$0xff] }
  0x83   : > { %v1244_v42 = vadd.f32 %v1212_v14, %v1143_v40  ;;  %v1213_v23 = vmul.f32 %v1699_v1, %v2018_v49  ;;  %v539_v57 = vadd.f32 %v507_v33, %v438_v62  ;;  %v608_v46 = vmul.f32 %v1645_v31, %v1174_v5  ;;  %v2090_v40 = vld [vmem:[#allocation2 + $0x13a] sm:$0xff] }
  0x84   : > { %v1043_v2 = vadd.f32 %v1011_v16, %v941_v63  ;;  %v841_v10 = vadd.f32 %v809_v38, %v740_v53  ;;  %v910_v25 = vmul.f32 %v1675_v45, %v1175_v0  ;;  %v407_v12 = vmul.f32 %v1618_v22, %v973_v15 }
  0x85   : > { %1276 = vst.msk [vmem:[%s1750_s20 + $0x90] sm:$0xff] %vm233_vm0, %v1244_v42  ;;  %v1012_v54 = vmul.f32 %v1683_v50, %v975_v6  ;;  %v1113_v55 = vmul.f32 %v1688_v51, %v2028_v7  ;;  %v640_v11 = vadd.f32 %v608_v46, %v539_v57  ;;  %v709_v4 = vmul.f32 %v1665_v43, %v974_v39  ;;  %v2117_v57 = vld [vmem:[#allocation2 + $0x141] sm:$0xff] }
  0x86   : > { %v1144_v19 = vadd.f32 %v1112_v24, %v1043_v2  ;;  %v942_v5 = vadd.f32 %v910_v25, %v841_v10  ;;  %v439_v47 = vadd.f32 %v1640_v30, %v407_v12  ;;  %v508_v37 = vmul.f32 %v1629_v26, %v1074_v18  ;;  %v2058_v26 = vld [vmem:[%s2281_s1] ss:$0 sm:$0xff]  ;;  %v2125_v25 = vld [vmem:[%s2281_s1 + $0x4] ss:$0 sm:$0xff] }
  0x87   : > { %v1214_v22 = vmul.f32 %v1699_v1, %v2034_v35  ;;  %v741_v15 = vadd.f32 %v709_v4, %v640_v11  ;;  %v810_v3 = vmul.f32 %v1670_v44, %v1075_v56  ;;  %v609_v29 = vmul.f32 %v1645_v31, %v1175_v0 }
  0x88   : > { %v1245_v60 = vadd.f32 %v1213_v23, %v1144_v19  ;;  %v1044_v13 = vadd.f32 %v1012_v54, %v942_v5  ;;  %v540_v52 = vadd.f32 %v508_v37, %v439_v47  ;;  %v408_v30 = vmul.f32 %v2058_v26, %v974_v39  ;;  %v2145_v37 = vld [vmem:[%s2281_s1 + $0x6] ss:$0 sm:$0xff] }
  0x89   : > { %v842_v18 = vadd.f32 %v810_v3, %v741_v15  ;;  %v911_v28 = vmul.f32 %v1675_v45, %v2018_v49  ;;  %v1013_v31 = vmul.f32 %v1683_v50, %v2043_v41  ;;  %v710_v0 = vmul.f32 %v1665_v43, %v975_v6  ;;  %v2151_v15 = vld [vmem:[%s2281_s1 + $0x7] ss:$0 sm:$0xff] }
  0x8a   : > { %1277 = vst.msk [vmem:[%s1750_s20 + $0x98] sm:$0xff] %vm233_vm0, %v1245_v60  ;;  %v1145_v8 = vadd.f32 %v1113_v55, %v1044_v13  ;;  %v641_v32 = vadd.f32 %v609_v29, %v540_v52  ;;  %v440_v39 = vadd.f32 %v2073_v27, %v408_v30  ;;  %v509_v43 = vmul.f32 %v2079_v48, %v1075_v56  ;;  %v2095_v56 = vld [vmem:[%s2281_s1 + $0x2] ss:$0 sm:$0xff]  ;;  %v2165_v30 = vld [vmem:[%s2281_s1 + $0x8] ss:$0 sm:$0xff] }
  0x8b   : > { %v943_v36 = vadd.f32 %v911_v28, %v842_v18  ;;  %v1114_v14 = vmul.f32 %v1688_v51, %v2051_v21  ;;  %v1215_v9 = vmul.f32 %v1699_v1, %v2053_v20  ;;  %v811_v59 = vmul.f32 %v1670_v44, %v2028_v7  ;;  %v2136_v55 = vld [vmem:[#allocation2 + $0x142] sm:$0xff] }
  0x8c   : > { %v1246_v58 = vadd.f32 %v1214_v22, %v1145_v8  ;;  %v742_v61 = vadd.f32 %v710_v0, %v641_v32  ;;  %v541_v16 = vadd.f32 %v509_v43, %v440_v39  ;;  %v610_v62 = vmul.f32 %v2095_v56, %v2018_v49  ;;  %v2111_v49 = vld [vmem:[%s2281_s1 + $0x3] ss:$0 sm:$0xff]  ;;  %v979_v0 = vld [vmem:[#allocation2 + $0x150] sm:$0xff] }
  0x8d   : > { %v1045_v33 = vadd.f32 %v1013_v31, %v943_v36  ;;  %v912_v63 = vmul.f32 %v1675_v45, %v2034_v35  ;;  %v1014_v44 = vmul.f32 %v1683_v50, %v2068_v17  ;;  %v409_v24 = vmul.f32 %v2058_v26, %v975_v6  ;;  %v978_v6 = vld [vmem:[#allocation2 + $0x140] sm:$0xff]  ;;  %v1080_v8 = vld [vmem:[#allocation2 + $0x151] sm:$0xff] }
  0x8e   : > { %1278 = vst.msk [vmem:[%s1750_s20 + $0xa0] sm:$0xff] %vm233_vm0, %v1246_v58  ;;  %v843_v53 = vadd.f32 %v811_v59, %v742_v61  ;;  %v1115_v38 = vmul.f32 %v1688_v51, %v2088_v34  ;;  %v642_v42 = vadd.f32 %v610_v62, %v541_v16  ;;  %v711_v45 = vmul.f32 %v2111_v49, %v2043_v41  ;;  %v1181_v58 = vld [vmem:[#allocation2 + $0x152] sm:$0xff] }
  0x8f   : > { %v1146_v23 = vadd.f32 %v1114_v14, %v1045_v33  ;;  %v1216_v50 = vmul.f32 %v1699_v1, %v2090_v40  ;;  %v441_v46 = vadd.f32 %v2073_v27, %v409_v24  ;;  %v510_v51 = vmul.f32 %v2079_v48, %v2028_v7  ;;  %v2132_v1 = vld [vmem:[%s2281_s1 + $0x5] ss:$0 sm:$0xff] }
  0x90   : > { %v944_v2 = vadd.f32 %v912_v63, %v843_v53  ;;  %v743_v10 = vadd.f32 %v711_v45, %v642_v42  ;;  %v812_v12 = vmul.f32 %v2125_v25, %v2051_v21  ;;  %v913_v54 = vmul.f32 %v2132_v1, %v2053_v20  ;;  %v980_v53 = vld [vmem:[#allocation2 + $0x158] sm:$0xff] }
  0x91   : > { %v1247_v7 = vadd.f32 %v1215_v9, %v1146_v23  ;;  %v542_v11 = vadd.f32 %v510_v51, %v441_v46  ;;  %v611_v4 = vmul.f32 %v2095_v56, %v2034_v35  ;;  %v410_v19 = vmul.f32 %v2058_v26, %v2043_v41 }
  0x92   : > { %v1046_v5 = vadd.f32 %v1014_v44, %v944_v2  ;;  %v844_v47 = vadd.f32 %v812_v12, %v743_v10  ;;  %v1015_v22 = vmul.f32 %v2145_v37, %v978_v6  ;;  %v1116_v35 = vmul.f32 %v2151_v15, %v2117_v57  ;;  %v1182_v10 = vld [vmem:[#allocation2 + $0x15a] sm:$0xff] }
  0x93   : > { %1279 = vst.msk [vmem:[%s1750_s20 + $0xa8] sm:$0xff] %vm233_vm0, %v1247_v7  ;;  %v643_v41 = vadd.f32 %v611_v4, %v542_v11  ;;  %v712_v3 = vmul.f32 %v2111_v49, %v2068_v17  ;;  %v442_v29 = vadd.f32 %v2073_v27, %v410_v19  ;;  %v511_v60 = vmul.f32 %v2079_v48, %v2051_v21 }
  0x94   : > { %v1147_v13 = vadd.f32 %v1115_v38, %v1046_v5  ;;  %v945_v52 = vadd.f32 %v913_v54, %v844_v47  ;;  %v1217_v18 = vmul.f32 %v2165_v30, %v2136_v55  ;;  %v813_v28 = vmul.f32 %v2125_v25, %v2088_v34  ;;  %v1081_v38 = vld [vmem:[#allocation2 + $0x159] sm:$0xff] }
  0x95   : > { %v744_v31 = vadd.f32 %v712_v3, %v643_v41  ;;  %v543_v32 = vadd.f32 %v511_v60, %v442_v29  ;;  %v612_v21 = vmul.f32 %v2095_v56, %v2053_v20  ;;  %v411_v39 = vmul.f32 %v2058_v26, %v2068_v17  ;;  %v1082_v41 = vld [vmem:[#allocation2 + $0x169] sm:$0xff] }
  0x96   : > { %v1248_v43 = vadd.f32 %v1216_v50, %v1147_v13  ;;  %v1047_v36 = vadd.f32 %v1015_v22, %v945_v52  ;;  %v914_v14 = vmul.f32 %v2132_v1, %v2090_v40  ;;  %v713_v9 = vmul.f32 %v2111_v49, %v978_v6 }
  0x97   : > { %v845_v59 = vadd.f32 %v813_v28, %v744_v31  ;;  %v644_v61 = vadd.f32 %v612_v21, %v543_v32  ;;  %v443_v16 = vadd.f32 %v2073_v27, %v411_v39  ;;  %v512_v62 = vmul.f32 %v2079_v48, %v2088_v34  ;;  %v1183_v28 = vld [vmem:[#allocation2 + $0x16a] sm:$0xff] }
  0x98   : > { %1280 = vst.msk [vmem:[%s1750_s20 + $0xb0] sm:$0xff] %vm233_vm0, %v1248_v43  ;;  %v1148_v20 = vadd.f32 %v1116_v35, %v1047_v36  ;;  %v1016_v17 = vmul.f32 %v2145_v37, %v979_v0  ;;  %v1117_v33 = vmul.f32 %v2151_v15, %v1080_v8  ;;  %v814_v63 = vmul.f32 %v2125_v25, %v2117_v57  ;;  %v981_v35 = vld [vmem:[#allocation2 + $0x168] sm:$0xff] }
  0x99   : > { %v946_v44 = vadd.f32 %v914_v14, %v845_v59  ;;  %v745_v24 = vadd.f32 %v713_v9, %v644_v61  ;;  %v544_v42 = vadd.f32 %v512_v62, %v443_v16  ;;  %v613_v45 = vmul.f32 %v2095_v56, %v2090_v40  ;;  %v982_v59 = vld [vmem:[#allocation2 + $0x170] sm:$0xff] }
  0x9a   : > { %v1249_v34 = vadd.f32 %v1217_v18, %v1148_v20  ;;  %v1218_v23 = vmul.f32 %v2165_v30, %v1181_v58  ;;  %v915_v50 = vmul.f32 %v2132_v1, %v2136_v55  ;;  %v412_v46 = vmul.f32 %v2058_v26, %v978_v6 }
  0x9b   : > { %v1048_v51 = vadd.f32 %v1016_v17, %v946_v44  ;;  %v846_v2 = vadd.f32 %v814_v63, %v745_v24  ;;  %v645_v12 = vadd.f32 %v613_v45, %v544_v42  ;;  %v714_v54 = vmul.f32 %v2111_v49, %v979_v0  ;;  %v1083_v17 = vld [vmem:[#allocation2 + $0x171] sm:$0xff] }
  0x9c   : > { %1281 = vst.msk [vmem:[%s1750_s20 + $0xb8] sm:$0xff] %vm233_vm0, %v1249_v34  ;;  %v1017_v7 = vmul.f32 %v2145_v37, %v980_v53  ;;  %v1118_v40 = vmul.f32 %v2151_v15, %v1081_v38  ;;  %v444_v11 = vadd.f32 %v2073_v27, %v412_v46  ;;  %v513_v4 = vmul.f32 %v2079_v48, %v2117_v57  ;;  %v1184_v24 = vld [vmem:[#allocation2 + $0x172] sm:$0xff] }
  0x9d   : > { %v1149_v19 = vadd.f32 %v1117_v33, %v1048_v51  ;;  %v947_v5 = vadd.f32 %v915_v50, %v846_v2  ;;  %v746_v6 = vadd.f32 %v714_v54, %v645_v12  ;;  %v815_v47 = vmul.f32 %v2125_v25, %v1080_v8  ;;  %v983_v12 = vld [vmem:[#allocation2 + $0x180] sm:$0xff] }
  0x9e   : > { %v1219_v22 = vmul.f32 %v2165_v30, %v1182_v10  ;;  %v545_v3 = vadd.f32 %v513_v4, %v444_v11  ;;  %v614_v29 = vmul.f32 %v2095_v56, %v2136_v55  ;;  %v413_v60 = vmul.f32 %v2058_v26, %v979_v0  ;;  %v1084_v54 = vld [vmem:[#allocation2 + $0x181] sm:$0xff] }
  0x9f   : > { %v1250_v13 = vadd.f32 %v1218_v23, %v1149_v19  ;;  %v1049_v52 = vadd.f32 %v1017_v7, %v947_v5  ;;  %v847_v18 = vadd.f32 %v815_v47, %v746_v6  ;;  %v916_v57 = vmul.f32 %v2132_v1, %v1181_v58 }
  0xa0   : > { %v646_v31 = vadd.f32 %v614_v29, %v545_v3  ;;  %v715_v32 = vmul.f32 %v2111_v49, %v980_v53  ;;  %v445_v21 = vadd.f32 %v2073_v27, %v413_v60  ;;  %v514_v39 = vmul.f32 %v2079_v48, %v1080_v8 }
  0xa1   : > { %1282 = vst.msk [vmem:[%s1750_s20 + $0xc0] sm:$0xff] %vm233_vm0, %v1250_v13  ;;  %v1150_v43 = vadd.f32 %v1118_v40, %v1049_v52  ;;  %v948_v36 = vadd.f32 %v916_v57, %v847_v18  ;;  %v1018_v55 = vmul.f32 %v2145_v37, %v981_v35  ;;  %v1119_v0 = vmul.f32 %v2151_v15, %v1082_v41  ;;  %v1185_v52 = vld [vmem:[#allocation2 + $0x182] sm:$0xff] }
  0xa2   : > { %v747_v14 = vadd.f32 %v715_v32, %v646_v31  ;;  %v816_v9 = vmul.f32 %v2125_v25, %v1081_v38  ;;  %v546_v61 = vadd.f32 %v514_v39, %v445_v21  ;;  %v615_v16 = vmul.f32 %v2095_v56, %v1181_v58 }
  0xa3   : > { %v1251_v62 = vadd.f32 %v1219_v22, %v1150_v43  ;;  %v1050_v20 = vadd.f32 %v1018_v55, %v948_v36  ;;  %v1220_v8 = vmul.f32 %v2165_v30, %v1183_v28  ;;  %v414_v33 = vmul.f32 %v2058_v26, %v980_v53  ;;  %v984_v43 = vld [vmem:[#allocation2 + $0x188] sm:$0xff] }
  0xa4   : > { %v848_v63 = vadd.f32 %v816_v9, %v747_v14  ;;  %v917_v44 = vmul.f32 %v2132_v1, %v1182_v10  ;;  %v647_v42 = vadd.f32 %v615_v16, %v546_v61  ;;  %v716_v45 = vmul.f32 %v2111_v49, %v981_v35  ;;  %v1085_v61 = vld [vmem:[#allocation2 + $0x189] sm:$0xff] }
  0xa5   : > { %1283 = vst.msk [vmem:[%s1750_s20 + $0xc8] sm:$0xff] %vm233_vm0, %v1251_v62  ;;  %v1151_v34 = vadd.f32 %v1119_v0, %v1050_v20  ;;  %v1019_v23 = vmul.f32 %v2145_v37, %v982_v59  ;;  %v446_v58 = vadd.f32 %v2073_v27, %v414_v33  ;;  %v515_v50 = vmul.f32 %v2079_v48, %v1081_v38 }
  0xa6   : > { %v949_v46 = vadd.f32 %v917_v44, %v848_v63  ;;  %v1120_v53 = vmul.f32 %v2151_v15, %v1083_v17  ;;  %v748_v51 = vadd.f32 %v716_v45, %v647_v42  ;;  %v817_v2 = vmul.f32 %v2125_v25, %v1082_v41  ;;  %v1186_v44 = vld [vmem:[#allocation2 + $0x18a] sm:$0xff] }
  0xa7   : > { %v1252_v7 = vadd.f32 %v1220_v8, %v1151_v34  ;;  %v1221_v40 = vmul.f32 %v2165_v30, %v1184_v24  ;;  %v547_v11 = vadd.f32 %v515_v50, %v446_v58  ;;  %v616_v4 = vmul.f32 %v2095_v56, %v1182_v10  ;;  %v1086_v50 = vld [vmem:[#allocation2 + $0x199] sm:$0xff] }
  0xa8   : > { %v1051_v19 = vadd.f32 %v1019_v23, %v949_v46  ;;  %v849_v5 = vadd.f32 %v817_v2, %v748_v51  ;;  %v918_v6 = vmul.f32 %v2132_v1, %v1183_v28  ;;  %v415_v38 = vmul.f32 %v2058_v26, %v981_v35 }
  0xa9   : > { %1284 = vst.msk [vmem:[%s1750_s20 + $0xd0] sm:$0xff] %vm233_vm0, %v1252_v7  ;;  %v1020_v47 = vmul.f32 %v2145_v37, %v983_v12  ;;  %v1121_v22 = vmul.f32 %v2151_v15, %v1084_v54  ;;  %v648_v3 = vadd.f32 %v616_v4, %v547_v11  ;;  %v717_v29 = vmul.f32 %v2111_v49, %v982_v59  ;;  %v1187_v7 = vld [vmem:[#allocation2 + $0x19a] sm:$0xff] }
  0xaa   : > { %v1152_v60 = vadd.f32 %v1120_v53, %v1051_v19  ;;  %v950_v13 = vadd.f32 %v918_v6, %v849_v5  ;;  %v447_v10 = vadd.f32 %v2073_v27, %v415_v38  ;;  %v516_v18 = vmul.f32 %v2079_v48, %v1082_v41  ;;  %v986_v53 = vld [vmem:[#allocation2 + $0x1a0] sm:$0xff] }
  0xab   : > { %v749_v57 = vadd.f32 %v717_v29, %v648_v3  ;;  %v818_v35 = vmul.f32 %v2125_v25, %v1083_v17  ;;  %v617_v31 = vmul.f32 %v2095_v56, %v1183_v28  ;;  %v718_v32 = vmul.f32 %v2111_v49, %v983_v12  ;;  %v1087_v5 = vld [vmem:[#allocation2 + $0x1a1] sm:$0xff] }
  0xac   : > { %v1253_v21 = vadd.f32 %v1221_v40, %v1152_v60  ;;  %v1052_v39 = vadd.f32 %v1020_v47, %v950_v13  ;;  %v548_v36 = vadd.f32 %v516_v18, %v447_v10  ;;  %v416_v55 = vmul.f32 %v2058_v26, %v982_v59  ;;  %v985_v59 = vld [vmem:[#allocation2 + $0x198] sm:$0xff] }
  0xad   : > { %v1222_v0 = vmul.f32 %v2165_v30, %v1185_v52  ;;  %v850_v14 = vadd.f32 %v818_v35, %v749_v57  ;;  %v919_v9 = vmul.f32 %v2132_v1, %v1184_v24  ;;  %v517_v62 = vmul.f32 %v2079_v48, %v1083_v17 }
  0xae   : > { %1285 = vst.msk [vmem:[%s1750_s20 + $0xd8] sm:$0xff] %vm233_vm0, %v1253_v21  ;;  %v1153_v41 = vadd.f32 %v1121_v22, %v1052_v39  ;;  %v649_v16 = vadd.f32 %v617_v31, %v548_v36  ;;  %v448_v28 = vadd.f32 %v2073_v27, %v416_v55  ;;  %v1021_v8 = vmul.f32 %v2145_v37, %v984_v43 }
  0xaf   : > { %v951_v20 = vadd.f32 %v919_v9, %v850_v14  ;;  %v819_v26 = vmul.f32 %v2125_v25, %v1084_v54  ;;  %v618_v33 = vmul.f32 %v2095_v56, %v1184_v24  ;;  %v719_v34 = vmul.f32 %v2111_v49, %v984_v43 }
  0xb0   : > { %v1254_v63 = vadd.f32 %v1222_v0, %v1153_v41  ;;  %v750_v42 = vadd.f32 %v718_v32, %v649_v16  ;;  %v549_v45 = vadd.f32 %v517_v62, %v448_v28  ;;  %v1122_v58 = vmul.f32 %v2151_v15, %v1085_v61 }
  0xb1   : > { %v1053_v23 = vadd.f32 %v1021_v8, %v951_v20  ;;  %v920_v48 = vmul.f32 %v2132_v1, %v1185_v52  ;;  %v1022_v17 = vmul.f32 %v2145_v37, %v985_v59  ;;  %v1223_v24 = vmul.f32 %v2165_v30, %v1186_v44 }
  0xb2   : > { %1286 = vst.msk [vmem:[%s1750_s20 + $0xe0] sm:$0xff] %vm233_vm0, %v1254_v63  ;;  %v851_v27 = vadd.f32 %v819_v26, %v750_v42  ;;  %v650_v46 = vadd.f32 %v618_v33, %v549_v45  ;;  %v820_v49 = vmul.f32 %v2125_v25, %v1085_v61  ;;  %v1123_v54 = vmul.f32 %v2151_v15, %v1086_v50  ;;  %v1188_v25 = vld [vmem:[#allocation2 + $0x1a2] sm:$0xff] }
  0xb3   : > { %v1154_v56 = vadd.f32 %v1122_v58, %v1053_v23  ;;  %v921_v4 = vmul.f32 %v2132_v1, %v1186_v44  ;;  %v1023_v19 = vmul.f32 %v2145_v37, %v986_v53  ;;  %v1224_v38 = vmul.f32 %v2165_v30, %v1187_v7 }
  0xb4   : > { %v952_v51 = vadd.f32 %v920_v48, %v851_v27  ;;  %v751_v2 = vadd.f32 %v719_v34, %v650_v46  ;;  %v1124_v29 = vmul.f32 %v2151_v15, %v1087_v5  ;;  %v1225_v13 = vmul.f32 %v2165_v30, %v1188_v25 }
  0xb5   : > { %v1255_v12 = vadd.f32 %v1223_v24, %v1154_v56 }
  0xb6   : > { %v1054_v40 = vadd.f32 %v1022_v17, %v952_v51  ;;  %v852_v11 = vadd.f32 %v820_v49, %v751_v2 }
  0xb7   : > { %1287 = vst.msk [vmem:[%s1750_s20 + $0xe8] sm:$0xff] %vm233_vm0, %v1255_v12 }
  0xb8   : > { %v1155_v6 = vadd.f32 %v1123_v54, %v1054_v40  ;;  %v953_v47 = vadd.f32 %v921_v4, %v852_v11 }
  0xba   : > { %v1256_v22 = vadd.f32 %v1224_v38, %v1155_v6  ;;  %v1055_v3 = vadd.f32 %v1023_v19, %v953_v47 }
  0xbc   : > { %1288 = vst.msk [vmem:[%s1750_s20 + $0xf0] sm:$0xff] %vm233_vm0, %v1256_v22  ;;  %v1156_v60 = vadd.f32 %v1124_v29, %v1055_v3 }
  0xbe   : > { %v1257_v1 = vadd.f32 %v1225_v13, %v1156_v60 }
  0xc0   : > { %1289 = vst.msk [vmem:[%s1750_s20 + $0xf8] sm:$0xff] %vm233_vm0, %v1257_v1 }
  0xc1 PF: > { %s13_s14 = sadd.s32 1, %s1483_s14   ;;  %s2284_s12 = smov %s1479_s13 }
  0xc2   : > { %p10_p5 = scmp.ge.s32.totalorder %s13_s14, 4   ;;  %s2285_s13 = smov %s2287_s15 }
  0xc4   :  { %12 = sbr.rel (!%p10_p5) target bundleno = 2 (0x2), region = 71 }

</bundles_post_ra>
